<compile_context>
chip_gen: v5e
topology: v5e:2x2
jax: 0.10.0
libtpu: 0.0.40
codegen_flags: <defaults>
</compile_context>

<pallas_src>
import jax
import jax.numpy as jnp
from jax import lax
from jax.experimental import pallas as pl
from jax.experimental.pallas import tpu as pltpu

LANE = 128  # lane-dense logits width (10 real classes, zero-padded to 128)


def _fused_forward_kernel(x_ref, gt_ref, wc_ref, wl_ref, b_ref, o_ref):
    # x_ref:  (BC, Hp*Wp)  circularly padded images (flattened), one batch chunk
    # gt_ref: (Hp*Wp, K*K) pool-first operator (0/1 indicators / L)
    # wc_ref: (K*K, NH)    conv weight, (ki,kj)-row-major flattened, transposed
    # wl_ref: (NH, 128)    linear weight, transposed, zero-padded 10 -> 128 lanes
    # b_ref:  (1, 128)     fused bias  lin_b + conv_b @ lin_w^T, zero-padded
    # o_ref:  (BC, 128)    lane-dense logits (cols 10..127 are zero)
    pooled = jnp.dot(x_ref[...], gt_ref[...],
                     preferred_element_type=jnp.float32,
                     precision=lax.Precision.HIGHEST)              # (BC, K*K) mean patch
    hidden = jnp.dot(pooled, wc_ref[...],
                     preferred_element_type=jnp.float32,
                     precision=lax.Precision.HIGHEST)              # (BC, NH)  pooled conv
    logits = jnp.dot(hidden, wl_ref[...],
                     preferred_element_type=jnp.float32,
                     precision=lax.Precision.HIGHEST) + b_ref[...]  # (BC, 128)
    o_ref[...] = logits.astype(o_ref.dtype)


@jax.jit
def simple_conv_linear_forward(x, conv_w, conv_b, lin_w, lin_b):
    """Forward pass of simple_Conv_linear.

    x:      (B, 1, H, W) float32   (NCHW)
    conv_w: (NH, 1, K, K) float32  (PyTorch OIHW conv weight)
    conv_b: (NH,) float32
    lin_w:  (10, NH) float32       (PyTorch Linear weight)
    lin_b:  (10,) float32
    returns (B, 10) float32
    """
    B, C, H, W = x.shape
    assert C == 1
    NH, _, K, K2 = conv_w.shape
    assert K == K2
    NOUT = lin_w.shape[0]
    pad = K // 2
    Hp, Wp = H + 2 * pad, W + 2 * pad
    Ho, Wo = Hp - K + 1, Wp - K + 1
    L, KK, HW = Ho * Wo, K * K, Hp * Wp

    # --- data plumbing (only batch-proportional cost: the circular pad itself) ---
    x_pad = jnp.pad(x[:, 0].astype(jnp.float32),
                    ((0, 0), (pad, pad), (pad, pad)), mode='wrap')   # circular padding
    x_flat = x_pad.reshape(B, HW)                                    # (B, Hp*Wp)

    # --- constant pool-first operator: G[ki*K+kj, h*Wp+w] = 1 iff padded pixel (h,w)
    #     is touched by patch tap (ki,kj) over the Ho x Wo output window; /L = mean ---
    h = jnp.arange(Hp)
    w = jnp.arange(Wp)
    k = jnp.arange(K)
    mh = (h[None, :] >= k[:, None]) & (h[None, :] < k[:, None] + Ho)   # (K, Hp)
    mw = (w[None, :] >= k[:, None]) & (w[None, :] < k[:, None] + Wo)   # (K, Wp)
    g = (mh[:, None, :, None] & mw[None, :, None, :]).reshape(KK, HW)
    gt = g.astype(jnp.float32).T / float(L)                            # (HW, KK)

    # --- parameter packing (batch-independent) ---
    wc = conv_w.reshape(NH, KK).T.astype(jnp.float32)                  # (KK, NH)
    wl = lin_w.T.astype(jnp.float32)                                   # (NH, NOUT)
    wl_p = jnp.zeros((NH, LANE), jnp.float32).at[:, :NOUT].set(wl)
    b_fused = lin_b.astype(jnp.float32) + jnp.dot(
        conv_b.astype(jnp.float32), wl, precision=lax.Precision.HIGHEST)
    b_p = jnp.zeros((1, LANE), jnp.float32).at[0, :NOUT].set(b_fused)

    # --- single fused Pallas call over the whole (chunked) batch ---
    # Small B: one invocation (grid=(1,)).  Large B: multiple-of-8-row chunks on a
    # "parallel" axis (amortizes step overhead, shards across v7x's 2 TensorCores).
    if B > 128 and B % 8 == 0:
        block_b = 128 if B % 128 == 0 else 8
    else:
        block_b = B
    grid = (pl.cdiv(B, block_b),)

    out_padded = pl.pallas_call(
        _fused_forward_kernel,
        out_shape=jax.ShapeDtypeStruct((B, LANE), jnp.float32),
        grid=grid,
        in_specs=[
            pl.BlockSpec((block_b, HW), lambda i: (i, 0)),   # per-chunk padded images
            pl.BlockSpec((HW, KK), lambda i: (0, 0)),        # pool operator (resident)
            pl.BlockSpec((KK, NH), lambda i: (0, 0)),        # conv weight (resident)
            pl.BlockSpec((NH, LANE), lambda i: (0, 0)),      # linear weight (resident)
            pl.BlockSpec((1, LANE), lambda i: (0, 0)),       # fused bias (resident)
        ],
        out_specs=pl.BlockSpec((block_b, LANE), lambda i: (i, 0)),
        compiler_params=pltpu.CompilerParams(
            dimension_semantics=("parallel",)),
    )(x_flat, gt, wc, wl_p, b_p)

    return out_padded[:, :NOUT]


if __name__ == "__main__":
    # Small shapes consistent with the module: 1 input channel, square spatial input.
    B, H, W = 2, 16, 16
    n_hidden, kernel_size = 32, 8

    key = jax.random.PRNGKey(0)
    kx, kcw, kcb, klw, klb = jax.random.split(key, 5)

    x = jax.random.normal(kx, (B, 1, H, W), dtype=jnp.float32)

    # Deterministic parameter init (shapes from nn.Conv2d(1, NH, K) and nn.Linear(NH, 10)).
    fan_conv = 1 * kernel_size * kernel_size
    conv_w = jax.random.uniform(kcw, (n_hidden, 1, kernel_size, kernel_size),
                                minval=-1.0, maxval=1.0, dtype=jnp.float32) / jnp.sqrt(fan_conv)
    conv_b = jax.random.uniform(kcb, (n_hidden,),
                                minval=-1.0, maxval=1.0, dtype=jnp.float32) / jnp.sqrt(fan_conv)
    lin_w = jax.random.uniform(klw, (10, n_hidden),
                               minval=-1.0, maxval=1.0, dtype=jnp.float32) / jnp.sqrt(n_hidden)
    lin_b = jax.random.uniform(klb, (10,),
                               minval=-1.0, maxval=1.0, dtype=jnp.float32) / jnp.sqrt(n_hidden)

    out = jax.block_until_ready(
        simple_conv_linear_forward(x, conv_w, conv_b, lin_w, lin_b))
    assert out.shape == (B, 10)

    # Pure-JAX reference (circular pad + VALID conv + global avg pool + linear).
    pad = kernel_size // 2
    x_pad_ref = jnp.pad(x[:, 0], ((0, 0), (pad, pad), (pad, pad)), mode='wrap')[:, None]
    ref_conv = lax.conv_general_dilated(
        x_pad_ref, conv_w, window_strides=(1, 1), padding='VALID',
        dimension_numbers=('NCHW', 'OIHW', 'NCHW'),
        precision=lax.Precision.HIGHEST)                             # (B, NH, Ho, Wo)
    ref_pooled = ref_conv.mean(axis=(2, 3)) + conv_b
    ref_out = jnp.dot(ref_pooled, lin_w.T, precision=lax.Precision.HIGHEST) + lin_b

    assert jnp.allclose(out, ref_out, rtol=1e-3, atol=1e-4), (out, ref_out)
    print("KERNEL_OK")
</pallas_src>

<mosaic_0001>
module attributes {stable_mosaic.version = 11 : i64} {
  func.func @_fused_forward_kernel(%arg0: i32, %arg1: memref<2x576xf32, #tpu.memory_space<vmem>>, %arg2: memref<576x64xf32, #tpu.memory_space<vmem>>, %arg3: memref<64x32xf32, #tpu.memory_space<vmem>>, %arg4: memref<32x128xf32, #tpu.memory_space<vmem>>, %arg5: memref<1x128xf32, #tpu.memory_space<vmem>>, %arg6: memref<2x128xf32, #tpu.memory_space<vmem>>) attributes {dimension_semantics = [#tpu.dimension_semantics<parallel>], iteration_bounds = array<i64: 1>, scalar_prefetch = 0 : i64, scratch_operands = 0 : i64, tpu.core_type = #tpu.core_type<tc>, window_params = [{transform_indices = @transform_0, window_bounds = array<i64: 2, 576>}, {pipeline_mode = #tpu.pipeline_mode<synchronous>, transform_indices = @transform_1, window_bounds = array<i64: 576, 64>}, {pipeline_mode = #tpu.pipeline_mode<synchronous>, transform_indices = @transform_2, window_bounds = array<i64: 64, 32>}, {pipeline_mode = #tpu.pipeline_mode<synchronous>, transform_indices = @transform_3, window_bounds = array<i64: 32, 128>}, {pipeline_mode = #tpu.pipeline_mode<synchronous>, transform_indices = @transform_4, window_bounds = array<i64: 1, 128>}, {transform_indices = @transform_5, window_bounds = array<i64: 2, 128>}]} {
    %c0 = arith.constant 0 : index
    %c0_0 = arith.constant 0 : index
    %0 = vector.load %arg1[%c0, %c0_0] : memref<2x576xf32, #tpu.memory_space<vmem>>, vector<2x576xf32>
    %c0_1 = arith.constant 0 : index
    %c0_2 = arith.constant 0 : index
    %1 = vector.load %arg2[%c0_1, %c0_2] : memref<576x64xf32, #tpu.memory_space<vmem>>, vector<576x64xf32>
    %cst = arith.constant dense<0.000000e+00> : vector<2x64xf32>
    %2 = tpu.matmul %0, %1, %cst {dimension_numbers = #tpu.dot_dimension_numbers<[1], [0], [0], [1], [0, 0, 1, 1], [], []>, precision = #tpu.contract_precision<fp32>} : vector<2x576xf32>, vector<576x64xf32>, vector<2x64xf32> -> vector<2x64xf32>
    %c0_3 = arith.constant 0 : index
    %c0_4 = arith.constant 0 : index
    %3 = vector.load %arg3[%c0_3, %c0_4] : memref<64x32xf32, #tpu.memory_space<vmem>>, vector<64x32xf32>
    %cst_5 = arith.constant dense<0.000000e+00> : vector<2x32xf32>
    %4 = tpu.matmul %2, %3, %cst_5 {dimension_numbers = #tpu.dot_dimension_numbers<[1], [0], [0], [1], [0, 0, 1, 1], [], []>, precision = #tpu.contract_precision<fp32>} : vector<2x64xf32>, vector<64x32xf32>, vector<2x32xf32> -> vector<2x32xf32>
    %c0_6 = arith.constant 0 : index
    %c0_7 = arith.constant 0 : index
    %5 = vector.load %arg4[%c0_6, %c0_7] : memref<32x128xf32, #tpu.memory_space<vmem>>, vector<32x128xf32>
    %cst_8 = arith.constant dense<0.000000e+00> : vector<2x128xf32>
    %6 = tpu.matmul %4, %5, %cst_8 {dimension_numbers = #tpu.dot_dimension_numbers<[1], [0], [0], [1], [0, 0, 1, 1], [], []>, precision = #tpu.contract_precision<fp32>} : vector<2x32xf32>, vector<32x128xf32>, vector<2x128xf32> -> vector<2x128xf32>
    %c0_9 = arith.constant 0 : index
    %c0_10 = arith.constant 0 : index
    %7 = vector.load %arg5[%c0_9, %c0_10] : memref<1x128xf32, #tpu.memory_space<vmem>>, vector<1x128xf32>
    %8 = vector.broadcast %7 : vector<1x128xf32> to vector<2x128xf32>
    %9 = arith.addf %6, %8 : vector<2x128xf32>
    %c0_11 = arith.constant 0 : index
    %c0_12 = arith.constant 0 : index
    %10 = vector.load %arg6[%c0_11, %c0_12] : memref<2x128xf32, #tpu.memory_space<vmem>>, vector<2x128xf32>
    tpu.vector_store %arg6[%c0_11, %c0_12], %9 {strides = array<i32>} : memref<2x128xf32, #tpu.memory_space<vmem>>, vector<2x128xf32>,
    return
  }
  func.func @transform_0(%arg0: i32) -> (i32, i32) {
    %c0_i32 = arith.constant 0 : i32
    %c0_i32_0 = arith.constant 0 : i32
    return %arg0, %c0_i32 : i32, i32
  }
  func.func @transform_1(%arg0: i32) -> (i32, i32) {
    %c0_i32 = arith.constant 0 : i32
    %c0_i32_0 = arith.constant 0 : i32
    %c0_i32_1 = arith.constant 0 : i32
    return %c0_i32, %c0_i32_0 : i32, i32
  }
  func.func @transform_2(%arg0: i32) -> (i32, i32) {
    %c0_i32 = arith.constant 0 : i32
    %c0_i32_0 = arith.constant 0 : i32
    %c0_i32_1 = arith.constant 0 : i32
    return %c0_i32, %c0_i32_0 : i32, i32
  }
  func.func @transform_3(%arg0: i32) -> (i32, i32) {
    %c0_i32 = arith.constant 0 : i32
    %c0_i32_0 = arith.constant 0 : i32
    %c0_i32_1 = arith.constant 0 : i32
    return %c0_i32, %c0_i32_0 : i32, i32
  }
  func.func @transform_4(%arg0: i32) -> (i32, i32) {
    %c0_i32 = arith.constant 0 : i32
    %c0_i32_0 = arith.constant 0 : i32
    %c0_i32_1 = arith.constant 0 : i32
    return %c0_i32, %c0_i32_0 : i32, i32
  }
  func.func @transform_5(%arg0: i32) -> (i32, i32) {
    %c0_i32 = arith.constant 0 : i32
    %c0_i32_0 = arith.constant 0 : i32
    return %arg0, %c0_i32 : i32, i32
  }
}

</mosaic_0001>

<bundles_post_ra>
// kernel: simple_conv_linear_forward.1
= control target key start
LH: loop header
LB: loop body
LE: loop exit
PB: predicated region body
PF: predicated region fallthrough
CT: control target
= control target key end

     0   :  { %s3691_s0 = inlined_call_operand.vmem [shape: f32[2,576], index: 0, kind: input, shape index: {}]   ;;  %s3692_s1 = inlined_call_operand.vmem [shape: f32[576,64], index: 1, kind: input, shape index: {}]   ;;  %s3693_s2 = inlined_call_operand.vmem [shape: f32[64,32], index: 2, kind: input, shape index: {}]   ;;  %s3694_s3 = inlined_call_operand.vmem [shape: f32[32,128], index: 3, kind: input, shape index: {}]   ;;  %s3695_s4 = inlined_call_operand.vmem [shape: f32[1,128], index: 4, kind: input, shape index: {}]   ;;  %s3696_s5 = inlined_call_operand.hbm [shape: f32[2,128], index: 5, kind: output, shape index: {}]  }
   0x1   :  { %v38_v0 = vld [vmem:[%s3692_s1 + $0x78] sm:$0xff]  ;;  %v37_v1 = vld [vmem:[%s3692_s1 + $0x70] sm:$0xff]  ;;  %v36_v2 = vld [vmem:[%s3692_s1 + $0x68] sm:$0xff] }
   0x2   :  { %v2243_v3 = vand.u32 4294901760, %v38_v0  ;;  %v2245_v4 = vand.u32 4294901760, %v37_v1  ;;  %v2247_v5 = vand.u32 4294901760, %v36_v2  ;;  %v35_v6 = vld [vmem:[%s3692_s1 + $0x60] sm:$0xff]  ;;  %v34_v7 = vld [vmem:[%s3692_s1 + $0x58] sm:$0xff]  ;;  %v33_v8 = vld [vmem:[%s3692_s1 + $0x50] sm:$0xff] }
   0x3   :  { %v2258_v9 = vand.u32 4294901760, %v35_v6  ;;  %v2260_v10 = vand.u32 4294901760, %v34_v7  ;;  %v2262_v11 = vand.u32 4294901760, %v33_v8  ;;  %v32_v12 = vld [vmem:[%s3692_s1 + $0x48] sm:$0xff]  ;;  %v31_v13 = vld [vmem:[%s3692_s1 + $0x40] sm:$0xff]  ;;  %v30_v18 = vld [vmem:[%s3692_s1 + $0x38] sm:$0xff] }
   0x4   :  { %113 = vmatpush.msra.mxu0 %v2243_v3  ;;  %v2272_v14 = vsub.f32 %v38_v0, %v2243_v3  ;;  %v2275_v15 = vsub.f32 %v37_v1, %v2245_v4  ;;  %309 = vmatpush.msra.mxu3 %v2243_v3  ;;  %v2279_v16 = vsub.f32 %v36_v2, %v2247_v5  ;;  %v2281_v17 = vand.u32 4294901760, %v32_v12  ;;  %v29_v26 = vld [vmem:[%s3692_s1 + $0x30] sm:$0xff]  ;;  %v28_v34 = vld [vmem:[%s3692_s1 + $0x28] sm:$0xff] }
   0x5   :  { %v2287_v19 = vsub.f32 %v35_v6, %v2258_v9  ;;  %v2290_v20 = vsub.f32 %v34_v7, %v2260_v10  ;;  %v2293_v21 = vsub.f32 %v33_v8, %v2262_v11  ;;  %v2300_v25 = vand.u32 4294901760, %v31_v13 }
   0x6   :  { %115 = vmatpush.msra.mxu0 %v2245_v4  ;;  %256 = vmatpush.msra.mxu2 %v2272_v14  ;;  %v155_v22 = vand.u32 4294901760, %v2272_v14  ;;  %v3712_v23 = vand.u32 4294901760, %v2275_v15  ;;  %v3710_v24 = vand.u32 4294901760, %v2279_v16  ;;  %v2307_v28 = vand.u32 4294901760, %v30_v18 }
   0x7   :  { %311 = vmatpush.msra.mxu3 %v2245_v4  ;;  %v3708_v27 = vand.u32 4294901760, %v2287_v19  ;;  %v2310_v29 = vsub.f32 %v32_v12, %v2281_v17  ;;  %v3706_v33 = vand.u32 4294901760, %v2290_v20  ;;  %v2328_v35 = vand.u32 4294901760, %v29_v26 }
   0x8   :  { %117 = vmatpush.msra.mxu0 %v2247_v5  ;;  %259 = vmatpush.msra.mxu2 %v2275_v15  ;;  %v156_v30 = vsub.f32 %v2272_v14, %v155_v22  ;;  %v162_v31 = vsub.f32 %v2275_v15, %v3712_v23  ;;  %v168_v32 = vsub.f32 %v2279_v16, %v3710_v24  ;;  %v3705_v36 = vand.u32 4294901760, %v2293_v21 }
   0x9   :  { %313 = vmatpush.msra.mxu3 %v2247_v5 }
   0xa   :  { %10 = vsyncpa [#allocation3], 0  ;;  %119 = vmatpush.msra.mxu0 %v2258_v9  ;;  %v157_v37 = vand.u32 4294901760, %v156_v30  ;;  %262 = vmatpush.msra.mxu2 %v2279_v16  ;;  %v163_v38 = vand.u32 4294901760, %v162_v31  ;;  %v174_v39 = vsub.f32 %v2287_v19, %v3708_v27  ;;  %v2337_v40 = vsub.f32 %v31_v13, %v2300_v25  ;;  %v27_v42 = vld [vmem:[%s3692_s1 + $0x20] sm:$0xff]  ;;  %v26_v48 = vld [vmem:[%s3692_s1 + $0x18] sm:$0xff] }
   0xb   :  { %315 = vmatpush.msra.mxu3 %v2258_v9  ;;  %v2340_v41 = vand.u32 4294901760, %v28_v34  ;;  %v169_v43 = vand.u32 4294901760, %v168_v32  ;;  %v180_v44 = vsub.f32 %v2290_v20, %v3706_v33  ;;  %v3703_v45 = vand.u32 4294901760, %v2310_v29  ;;  %v25_v54 = vld [vmem:[%s3692_s1 + $0x10] sm:$0xff]  ;;  %v21_v55 = vld [vmem:[%s3691_s0] sm:$0xff]  ;;  %v54_v60 = vld [vmem:[%s3692_s1 + $0xf8] sm:$0xff] }
   0xc   :  { %121 = vmatpush.msra.mxu0 %v2260_v10  ;;  %158 = vmatpush.msra.mxu1 %v157_v37  ;;  %v2351_v46 = vsub.f32 %v30_v18, %v2307_v28  ;;  %v186_v47 = vsub.f32 %v2293_v21, %v3705_v36  ;;  %v175_v49 = vand.u32 4294901760, %v174_v39  ;;  %v2362_v50 = vand.u32 4294901760, %v27_v42  ;;  %97 = vst [vmem:[#allocation1] ss:$4 sm:$0xff] %v21_v55  ;;  %v24_v62 = vld [vmem:[%s3692_s1 + $0x8] sm:$0xff]  ;;  %v23_v6 = vld [vmem:[%s3692_s1] sm:$0xff] }
   0xd   :  { %265 = vmatpush.msra.mxu2 %v2287_v19  ;;  %317 = vmatpush.msra.mxu3 %v2260_v10  ;;  %v3702_v51 = vand.u32 4294901760, %v2337_v40  ;;  %v2366_v52 = vsub.f32 %v29_v26, %v2328_v35  ;;  %v2371_v53 = vsub.f32 %v28_v34, %v2340_v41  ;;  %v181_v56 = vand.u32 4294901760, %v180_v44  ;;  %v53_v7 = vld [vmem:[%s3692_s1 + $0xf0] sm:$0xff]  ;;  %v52_v34 = vld [vmem:[%s3692_s1 + $0xe8] sm:$0xff]  ;;  %s2203_s12 = smov [#allocation2]   ;;  %s2166_s15 = sshll.u32 %s3696_s5, 4  ;;  %s2167_s15 = int_to_ptr.hbm [resolvable:$true] %s2166_s15 }
   0xe   :  { %123 = vmatpush.msra.mxu0 %v2262_v11  ;;  %164 = vmatpush.msra.mxu1 %v163_v38  ;;  %v192_v57 = vsub.f32 %v2310_v29, %v3703_v45  ;;  %v2383_v58 = vand.u32 4294901760, %v26_v48  ;;  %v3701_v59 = vand.u32 4294901760, %v2351_v46  ;;  %v187_v61 = vand.u32 4294901760, %v186_v47  ;;  %v51_v47 = vld [vmem:[%s3692_s1 + $0xe0] sm:$0xff]  ;;  %s2164_s13 = sshll.u32 %s2203_s12, 4  ;;  %s2165_s13 = int_to_ptr.vmem [resolvable:$true] %s2164_s13 }
   0xf   :  { %268 = vmatpush.msra.mxu2 %v2290_v20  ;;  %319 = vmatpush.msra.mxu3 %v2262_v11  ;;  %v198_v63 = vsub.f32 %v2337_v40, %v3702_v51  ;;  %v2398_v0 = vand.u32 4294901760, %v25_v54  ;;  %v3699_v1 = vand.u32 4294901760, %v2366_v52  ;;  %v2402_v2 = vsub.f32 %v27_v42, %v2362_v50  ;;  %v47_v45 = vld [vmem:[%s3692_s1 + $0xc0] sm:$0xff] }
  0x10   :  { %125 = vmatpush.msra.mxu0 %v2281_v17  ;;  %170 = vmatpush.msra.mxu1 %v169_v43  ;;  %v3698_v8 = vand.u32 4294901760, %v2371_v53  ;;  %v2413_v12 = vand.u32 4294901760, %v54_v60  ;;  %v193_v13 = vand.u32 4294901760, %v192_v57  ;;  %v204_v18 = vsub.f32 %v2351_v46, %v3701_v59 }
  0x11   :  { %271 = vmatpush.msra.mxu2 %v2293_v21  ;;  %321 = vmatpush.msra.mxu3 %v2281_v17  ;;  %v2419_v26 = vand.u32 4294901760, %v24_v62  ;;  %v2422_v30 = vsub.f32 %v26_v48, %v2383_v58  ;;  %v2426_v31 = vand.u32 4294901760, %v23_v6  ;;  %v2428_v32 = vand.u32 4294901760, %v53_v7 }
  0x12   :  { %127 = vmatpush.msra.mxu0 %v2300_v25  ;;  %176 = vmatpush.msra.mxu1 %v175_v49  ;;  %v199_v37 = vand.u32 4294901760, %v198_v63  ;;  %v210_v38 = vsub.f32 %v2366_v52, %v3699_v1  ;;  %v3697_v39 = vand.u32 4294901760, %v2402_v2  ;;  %v2439_v42 = vsub.f32 %v25_v54, %v2398_v0 }
  0x13   :  { %274 = vmatpush.msra.mxu2 %v2310_v29  ;;  %323 = vmatpush.msra.mxu3 %v2300_v25  ;;  %v216_v43 = vsub.f32 %v2371_v53, %v3698_v8  ;;  %v2447_v44 = vsub.f32 %v54_v60, %v2413_v12  ;;  %v205_v48 = vand.u32 4294901760, %v204_v18  ;;  %v3700_v49 = vand.u32 4294901760, %v2422_v30  ;;  %v50_v60 = vld [vmem:[%s3692_s1 + $0xd8] sm:$0xff]  ;;  %v49_v18 = vld [vmem:[%s3692_s1 + $0xd0] sm:$0xff]  ;;  %v48_v8 = vld [vmem:[%s3692_s1 + $0xc8] sm:$0xff] }
  0x14   :  { %129 = vmatpush.msra.mxu0 %v2307_v28  ;;  %182 = vmatpush.msra.mxu1 %v181_v56  ;;  %v2455_v54 = vsub.f32 %v24_v62, %v2419_v26  ;;  %v2457_v55 = vand.u32 4294901760, %v52_v34  ;;  %v2462_v56 = vsub.f32 %v23_v6, %v2426_v31  ;;  %v2465_v57 = vsub.f32 %v53_v7, %v2428_v32 }
  0x15   :  { %277 = vmatpush.msra.mxu2 %v2337_v40  ;;  %325 = vmatpush.msra.mxu3 %v2307_v28  ;;  %v222_v62 = vsub.f32 %v2402_v2, %v3697_v39  ;;  %v3704_v63 = vand.u32 4294901760, %v2439_v42  ;;  %v217_v6 = vand.u32 4294901760, %v216_v43  ;;  %v3707_v7 = vand.u32 4294901760, %v2447_v44 }
  0x16   :  { %131 = vmatpush.msra.mxu0 %v2328_v35  ;;  %188 = vmatpush.msra.mxu1 %v187_v61  ;;  %3744 = vst [vmem:[#allocation5_spill] sm:$0xff] %v2457_v55  ;;  %v211_v61 = vand.u32 4294901760, %v210_v38  ;;  %v3709_v38 = vand.u32 4294901760, %v2455_v54  ;;  %v2489_v39 = vsub.f32 %v52_v34, %v2457_v55  ;;  %v2491_v43 = vand.u32 4294901760, %v50_v60 }
  0x17   :  { %280 = vmatpush.msra.mxu2 %v2351_v46  ;;  %327 = vmatpush.msra.mxu3 %v2328_v35  ;;  %v3711_v1 = vand.u32 4294901760, %v2465_v57  ;;  %v234_v34 = vsub.f32 %v2439_v42, %v3704_v63  ;;  %v2507_v51 = vand.u32 4294901760, %v49_v18  ;;  %v2532_v27 = vand.u32 4294901760, %v47_v45 }
  0x18   :  { %133 = vmatpush.msra.mxu0 %v2340_v41  ;;  %194 = vmatpush.msra.mxu1 %v193_v13  ;;  %v2475_v13 = vand.u32 4294901760, %v51_v47  ;;  %v240_v63 = vsub.f32 %v2455_v54, %v3709_v38  ;;  %v3714_v36 = vand.u32 4294901760, %v2489_v39  ;;  %v2525_v33 = vsub.f32 %v50_v60, %v2491_v43 }
  0x19   :  { %283 = vmatpush.msra.mxu2 %v2366_v52  ;;  %329 = vmatpush.msra.mxu3 %v2340_v41  ;;  %v2543_v24 = vsub.f32 %v49_v18, %v2507_v51  ;;  %vm109_vm0 = vcmask 523264   ;;  %vm1969_vm1 = vcmask 261120  }
  0x1a   :  { %135 = vmatpush.msra.mxu0 %v2362_v50  ;;  %200 = vmatpush.msra.mxu1 %v199_v37  ;;  %v228_v37 = vsub.f32 %v2422_v30, %v3700_v49  ;;  %v223_v49 = vand.u32 4294901760, %v222_v62  ;;  %v2505_v59 = vsub.f32 %v51_v47, %v2475_v13  ;;  %v2517_v62 = vand.u32 4294901760, %v48_v8 }
  0x1b   :  { %286 = vmatpush.msra.mxu2 %v2371_v53  ;;  %331 = vmatpush.msra.mxu3 %v2362_v50  ;;  %v509_v18 = vsub.f32 %v2489_v39, %v3714_v36  ;;  %v3716_v14 = vand.u32 4294901760, %v2525_v33 }
  0x1c   :  { %137 = vmatpush.msra.mxu0 %v2383_v58  ;;  %206 = vmatpush.msra.mxu1 %v205_v48  ;;  %v3713_v48 = vand.u32 4294901760, %v2462_v56  ;;  %v229_v47 = vand.u32 4294901760, %v228_v37  ;;  %v235_v37 = vand.u32 4294901760, %v234_v34  ;;  %v3715_v38 = vand.u32 4294901760, %v2505_v59 }
  0x1d   :  { %289 = vmatpush.msra.mxu2 %v2402_v2  ;;  %333 = vmatpush.msra.mxu3 %v2383_v58  ;;  %v2549_v23 = vsub.f32 %v48_v8, %v2517_v62  ;;  %v241_v34 = vand.u32 4294901760, %v240_v63  ;;  %v44_v63 = vld [vmem:[%s3692_s1 + $0xa8] sm:$0xff] }
  0x1e   :  { %139 = vmatpush.msra.mxu0 %v2398_v0  ;;  %212 = vmatpush.msra.mxu1 %v211_v61  ;;  %v497_v61 = vsub.f32 %v2447_v44, %v3707_v7  ;;  %v503_v7 = vsub.f32 %v2465_v57, %v3711_v1  ;;  %v246_v60 = vsub.f32 %v2462_v56, %v3713_v48 }
  0x1f   :  { %292 = vmatpush.msra.mxu2 %v2422_v30  ;;  %335 = vmatpush.msra.mxu3 %v2398_v0  ;;  %v2565_v48 = vsub.f32 %v47_v45, %v2532_v27  ;;  %v515_v36 = vsub.f32 %v2505_v59, %v3715_v38  ;;  %v521_v38 = vsub.f32 %v2525_v33, %v3716_v14  ;;  %v3748_v14 = vand.u32 4294901760, %v2543_v24 }
  0x20   :  { %141 = vmatpush.msra.mxu0 %v2419_v26  ;;  %218 = vmatpush.msra.mxu1 %v217_v6  ;;  %v46_v6 = vld [vmem:[%s3692_s1 + $0xb8] sm:$0xff]  ;;  %v498_v1 = vand.u32 4294901760, %v497_v61  ;;  %v3745_v61 = vand.u32 4294901760, %v2275_v15  ;;  %v504_v8 = vand.u32 4294901760, %v503_v7  ;;  %v3746_v7 = vand.u32 4294901760, %v2279_v16 }
  0x21   :  { %295 = vmatpush.msra.mxu2 %v2439_v42  ;;  %337 = vmatpush.msra.mxu3 %v2419_v26  ;;  %v2590_v16 = vand.u32 4294901760, %v44_v63 }
  0x22   :  { %143 = vmatpush.msra.mxu0 %v2426_v31  ;;  %224 = vmatpush.msra.mxu1 %v223_v49  ;;  %v45_v49 = vld [vmem:[%s3692_s1 + $0xb0] sm:$0xff] }
  0x23   :  { %298 = vmatpush.msra.mxu2 %v2455_v54  ;;  %339 = vmatpush.msra.mxu3 %v2426_v31 }
  0x24   :  { %350 = vmatpush.msrb.mxu0 %v155_v22  ;;  %230 = vmatpush.msra.mxu1 %v229_v47  ;;  %v2559_v22 = vand.u32 4294901760, %v46_v6  ;;  %v247_v47 = vand.u32 4294901760, %v246_v60  ;;  %v510_v60 = vand.u32 4294901760, %v509_v18  ;;  %v516_v18 = vand.u32 4294901760, %v515_v36 }
  0x25   :  { %301 = vmatpush.msra.mxu2 %v2462_v56  ;;  %499 = vmatpush.msrb.mxu3 %v498_v1  ;;  %v3747_v1 = vand.u32 4294901760, %v2287_v19  ;;  %v522_v36 = vand.u32 4294901760, %v521_v38  ;;  %v41_v38 = vld [vmem:[%s3692_s1 + $0x90] sm:$0xff] }
  0x26   :  { %354 = vmatpush.msrb.mxu0 %v3745_v61  ;;  %236 = vmatpush.msra.mxu1 %v235_v37  ;;  %v2575_v61 = vand.u32 4294901760, %v45_v49  ;;  %v43_v37 = vld [vmem:[%s3692_s1 + $0xa0] sm:$0xff]  ;;  %v2588_v15 = vsub.f32 %v46_v6, %v2559_v22  ;;  %v527_v6 = vsub.f32 %v2543_v24, %v3748_v14 }
  0x27   :  { %454 = vmatpush.msrb.mxu2 %v2413_v12  ;;  %505 = vmatpush.msrb.mxu3 %v504_v8  ;;  %v2605_v19 = vand.u32 4294901760, %v43_v37  ;;  %v3749_v8 = vand.u32 4294901760, %v2290_v20  ;;  %v3751_v20 = vand.u32 4294901760, %v2293_v21 }
  0x28   :  { %358 = vmatpush.msrb.mxu0 %v3746_v7  ;;  %242 = vmatpush.msra.mxu1 %v241_v34  ;;  %v42_v34 = vld [vmem:[%s3692_s1 + $0x98] sm:$0xff]  ;;  %v2603_v45 = vsub.f32 %v45_v49, %v2575_v61  ;;  %v100_v7 = vld.sshfl [vmem:[#allocation1] sm:$0xff pattern:$0x73625140]  ;;  %v3719_v14 = vand.u32 4294901760, %v2588_v15  ;;  %v2616_v49 = vsub.f32 %v44_v63, %v2590_v16  ;;  %v528_v63 = vand.u32 4294901760, %v527_v6 }
  0x29   :  { %456 = vmatpush.msrb.mxu2 %v2428_v32  ;;  %511 = vmatpush.msrb.mxu3 %v510_v60  ;;  %v2634_v21 = vand.u32 4294901760, %v100_v7  ;;  %v2647_v6 = vand.u32 4294901760, %v41_v38 }
  0x2a   :  { %362 = vmatpush.msrb.mxu0 %v3747_v1  ;;  %248 = vmatpush.msra.mxu1 %v247_v47  ;;  %v3750_v1 = vand.u32 4294901760, %v2549_v23  ;;  %v3720_v60 = vand.u32 4294901760, %v2603_v45 }
  0x2b   :  { %458 = vmatpush.msrb.mxu2 %v2457_v55  ;;  %v2618_v55 = vand.u32 4294901760, %v42_v34  ;;  %517 = vmatpush.msrb.mxu3 %v516_v18  ;;  %v556_v18 = vand.u32 4294901760, %v2616_v49 }
  0x2c   :  { %366 = vmatpush.msrb.mxu0 %v3749_v8  ;;  %417 = vmatpush.msrb.mxu1 %v2243_v3  ;;  %v533_v47 = vsub.f32 %v2549_v23, %v3750_v1  ;;  %v3752_v3 = vand.u32 4294901760, %v2565_v48  ;;  %v2632_v1 = vsub.f32 %v43_v37, %v2605_v19  ;;  %v545_v37 = vsub.f32 %v2588_v15, %v3719_v14 }
  0x2d   :  { %460 = vmatpush.msrb.mxu2 %v2475_v13  ;;  %523 = vmatpush.msrb.mxu3 %v522_v36  ;;  %v551_v36 = vsub.f32 %v2603_v45, %v3720_v60  ;;  %v2661_v14 = vsub.f32 %v100_v7, %v2634_v21  ;;  %v557_v7 = vsub.f32 %v2616_v49, %v556_v18  ;;  %v3756_v60 = vand.u32 4294901760, %v2366_v52 }
  0x2e   :  { %370 = vmatpush.msrb.mxu0 %v3751_v20  ;;  %419 = vmatpush.msrb.mxu1 %v2245_v4  ;;  %v539_v8 = vsub.f32 %v2565_v48, %v3752_v3  ;;  %v3753_v4 = vand.u32 4294901760, %v2310_v29  ;;  %v534_v20 = vand.u32 4294901760, %v533_v47  ;;  %v40_v3 = vld [vmem:[%s3692_s1 + $0x88] sm:$0xff]  ;;  %v2650_v29 = vsub.f32 %v42_v34, %v2618_v55 }
  0x2f   :  { %462 = vmatpush.msrb.mxu2 %v2491_v43  ;;  %529 = vmatpush.msrb.mxu3 %v528_v63  ;;  %v2663_v34 = vand.u32 4294901760, %v40_v3  ;;  %v3757_v52 = vand.u32 4294901760, %v2371_v53 }
  0x30   :  { %374 = vmatpush.msrb.mxu0 %v3753_v4  ;;  %421 = vmatpush.msrb.mxu1 %v2247_v5  ;;  %v3754_v5 = vand.u32 4294901760, %v2337_v40  ;;  %v540_v47 = vand.u32 4294901760, %v539_v8  ;;  %v562_v4 = vand.u32 4294901760, %v2632_v1  ;;  %v39_v40 = vld [vmem:[%s3692_s1 + $0x80] sm:$0xff]  ;;  %v546_v8 = vand.u32 4294901760, %v545_v37 }
  0x31   :  { %464 = vmatpush.msrb.mxu2 %v2507_v51  ;;  %535 = vmatpush.msrb.mxu3 %v534_v20  ;;  %v568_v63 = vand.u32 4294901760, %v2650_v29  ;;  %v146_v37 = vand.u32 4294901760, %v2661_v14 }
  0x32   :  { %378 = vmatpush.msrb.mxu0 %v3754_v5  ;;  %423 = vmatpush.msrb.mxu1 %v2258_v9  ;;  %v3755_v9 = vand.u32 4294901760, %v2351_v46  ;;  %v2677_v5 = vsub.f32 %v41_v38, %v2647_v6  ;;  %v2682_v46 = vand.u32 4294901760, %v39_v40  ;;  %v563_v20 = vsub.f32 %v2632_v1, %v562_v4 }
  0x33   :  { %466 = vmatpush.msrb.mxu2 %v2517_v62  ;;  %541 = vmatpush.msrb.mxu3 %v540_v47  ;;  %v2690_v38 = vsub.f32 %v40_v3, %v2663_v34  ;;  %v569_v47 = vsub.f32 %v2650_v29, %v568_v63  ;;  %v147_v3 = vsub.f32 %v2661_v14, %v146_v37 }
  0x34   :  { %382 = vmatpush.msrb.mxu0 %v3755_v9  ;;  %425 = vmatpush.msrb.mxu1 %v2260_v10  ;;  %v552_v10 = vand.u32 4294901760, %v551_v36  ;;  %v574_v36 = vand.u32 4294901760, %v2677_v5  ;;  %v3758_v9 = vand.u32 4294901760, %v2402_v2  ;;  %v2704_v53 = vsub.f32 %v39_v40, %v2682_v46 }
  0x35   :  { %468 = vmatpush.msrb.mxu2 %v2532_v27  ;;  %547 = vmatpush.msrb.mxu3 %v546_v8  ;;  %v580_v8 = vand.u32 4294901760, %v2690_v38  ;;  %v3760_v40 = vand.u32 4294901760, %v2439_v42  ;;  %v3762_v42 = vand.u32 4294901760, %v2462_v56 }
  0x36   :  { %386 = vmatpush.msrb.mxu0 %v3756_v60  ;;  %427 = vmatpush.msrb.mxu1 %v2262_v11  ;;  %v101_v11 = vld.sshfl [vmem:[#allocation1 + $0x8] sm:$0xff pattern:$0x73625140]  ;;  %v558_v60 = vand.u32 4294901760, %v557_v7  ;;  %v575_v2 = vsub.f32 %v2677_v5, %v574_v36 }
  0x37   :  { %470 = vmatpush.msrb.mxu2 %v2559_v22  ;;  %553 = vmatpush.msrb.mxu3 %v552_v10  ;;  %v2709_v7 = vand.u32 4294901760, %v101_v11  ;;  %v586_v10 = vand.u32 4294901760, %v2704_v53 }
  0x38   :  { %390 = vmatpush.msrb.mxu0 %v3757_v52  ;;  %429 = vmatpush.msrb.mxu1 %v2281_v17  ;;  %v564_v17 = vand.u32 4294901760, %v563_v20  ;;  %v3759_v52 = vand.u32 4294901760, %v2422_v30  ;;  %v148_v30 = vand.u32 4294901760, %v147_v3 }
  0x39   :  { %472 = vmatpush.msrb.mxu2 %v2575_v61  ;;  %559 = vmatpush.msrb.mxu3 %v558_v60  ;;  %v2727_v20 = vsub.f32 %v101_v11, %v2709_v7  ;;  %v3761_v60 = vand.u32 4294901760, %v2455_v54 }
  0x3a   :  { %394 = vmatpush.msrb.mxu0 %v3758_v9  ;;  %431 = vmatpush.msrb.mxu1 %v2300_v25  ;;  %v570_v25 = vand.u32 4294901760, %v569_v47  ;;  %v587_v47 = vsub.f32 %v2704_v53, %v586_v10 }
  0x3b   :  { %474 = vmatpush.msrb.mxu2 %v2590_v16  ;;  %565 = vmatpush.msrb.mxu3 %v564_v17  ;;  %v487_v11 = vand.u32 4294901760, %v2727_v20  ;;  %v61_v17 = vld [vmem:[%s3692_s1 + $0x130] sm:$0xff] }
  0x3c   :  { %398 = vmatpush.msrb.mxu0 %v3759_v52  ;;  %433 = vmatpush.msrb.mxu1 %v2307_v28  ;;  %v581_v28 = vsub.f32 %v2690_v38, %v580_v8 }
  0x3d   :  { %476 = vmatpush.msrb.mxu2 %v2605_v19  ;;  %571 = vmatpush.msrb.mxu3 %v570_v25 }
  0x3e   :  { %402 = vmatpush.msrb.mxu0 %v3760_v40  ;;  %435 = vmatpush.msrb.mxu1 %v2328_v35  ;;  %v576_v35 = vand.u32 4294901760, %v575_v2  ;;  %v582_v54 = vand.u32 4294901760, %v581_v28  ;;  %v59_v28 = vld [vmem:[%s3692_s1 + $0x120] sm:$0xff] }
  0x3f   :  { %478 = vmatpush.msrb.mxu2 %v2618_v55  ;;  %149 = vmatmul.f32.vlgmr.msra.gmra.mxu0 %v148_v30 }
  0x40   :  { %406 = vmatpush.msrb.mxu0 %v3761_v60  ;;  %437 = vmatpush.msrb.mxu1 %v2340_v41  ;;  %v588_v41 = vand.u32 4294901760, %v587_v47  ;;  %v102_v47 = vld.sshfl [vmem:[#allocation1 + $0x10] sm:$0xff pattern:$0x73625140] }
  0x41   :  { %480 = vmatpush.msrb.mxu2 %v2647_v6  ;;  %577 = vmatpush.msrb.mxu3 %v576_v35 }
  0x42   :  { %410 = vmatpush.msrb.mxu0 %v3762_v42  ;;  %439 = vmatpush.msrb.mxu1 %v2362_v50  ;;  %v488_v50 = vsub.f32 %v2727_v20, %v487_v11 }
  0x43   :  { %482 = vmatpush.msrb.mxu2 %v2663_v34  ;;  %583 = vmatpush.msrb.mxu3 %v582_v54 }
  0x44   :  { %597 = vmatpush.msra.mxu0 %v2447_v44  ;;  %441 = vmatpush.msrb.mxu1 %v2383_v58  ;;  %v3763_v58 = vand.u32 4294901760, %v2447_v44  ;;  %v489_v56 = vand.u32 4294901760, %v488_v50  ;;  %v3765_v44 = vand.u32 4294901760, %v2489_v39  ;;  %v2965_v50 = vand.u32 4294901760, %v59_v28 }
  0x45   :  { %304 = vmatmul.f32.vlgmr.msra.gmra.mxu2 %v2661_v14  ;;  %343 = vmatmul.f32.vlgmr.msra.gmra.mxu3 %v146_v37  ;;  %v62_v37 = vld [vmem:[%s3692_s1 + $0x138] sm:$0xff] }
  0x46   :  { %600 = vmatpush.msra.mxu0 %v2465_v57  ;;  %443 = vmatpush.msrb.mxu1 %v2398_v0  ;;  %v3764_v0 = vand.u32 4294901760, %v2465_v57  ;;  %v3767_v57 = vld [vmem:[#allocation5_spill] sm:$0xff]  ;;  %v2919_v52 = vand.u32 4294901760, %v62_v37 }
  0x47   :  { %484 = vmatpush.msrb.mxu2 %v2682_v46  ;;  %589 = vmatpush.msrb.mxu3 %v588_v41 }
  0x48   :  { %603 = vmatpush.msra.mxu0 %v2489_v39  ;;  %445 = vmatpush.msrb.mxu1 %v2419_v26  ;;  %v3766_v26 = vand.u32 4294901760, %v2505_v59 }
  0x49   :  { %691 = vmatpush.msra.mxu2 %v3763_v58  ;;  %250 = vmatmul.f32.vlgmr.msra.gmra.mxu1 %v2634_v21 }
  0x4a   :  { %606 = vmatpush.msra.mxu0 %v2505_v59  ;;  %758 = vmatpush.msra.mxu3 %v2413_v12  ;;  %v3769_v59 = vand.u32 4294901760, %v2543_v24 }
  0x4b   :  { %695 = vmatpush.msra.mxu2 %v3764_v0  ;;  %447 = vmatpush.msrb.mxu1 %v2426_v31  ;;  %v3771_v31 = vand.u32 4294901760, %v2565_v48 }
  0x4c   :  { %609 = vmatpush.msra.mxu0 %v2525_v33  ;;  %760 = vmatpush.msra.mxu3 %v2428_v32 }
  0x4d   :  { %650 = vmatpush.msra.mxu1 %v2413_v12  ;;  %699 = vmatpush.msra.mxu2 %v3765_v44  ;;  %v3768_v12 = vand.u32 4294901760, %v2525_v33  ;;  %v3770_v33 = vand.u32 4294901760, %v2549_v23  ;;  %v57_v44 = vld [vmem:[%s3692_s1 + $0x110] sm:$0xff] }
  0x4e   :  { %490 = vmatmul.f32.vlgmr.msrb.gmra.mxu2 %v489_v56  ;;  %612 = vmatpush.msra.mxu0 %v2543_v24  ;;  %v3772_v24 = vand.u32 4294901760, %v2588_v15 }
  0x4f   :  { %652 = vmatpush.msra.mxu1 %v2428_v32  ;;  %703 = vmatpush.msra.mxu2 %v3766_v26  ;;  %v3773_v32 = vand.u32 4294901760, %v2603_v45  ;;  %v2976_v26 = vand.u32 4294901760, %v102_v47 }
  0x50   :  { %762 = vmatpush.msra.mxu3 %v3767_v57  ;;  %412 = vmatmul.f32.vlgmr.msrb.gmra.mxu0 %v2634_v21 }
  0x51   :  { %591 = vmatmul.f32.vlgmr.msrb.gmra.mxu3 %v2709_v7  ;;  %615 = vmatpush.msra.mxu0 %v2549_v23  ;;  %v70_v23 = vld [vmem:[%s3692_s1 + $0x178] sm:$0xff] }
  0x52   :  { %654 = vmatpush.msra.mxu1 %v3767_v57  ;;  %707 = vmatpush.msra.mxu2 %v3768_v12  ;;  %v2809_v39 = vand.u32 4294901760, %v70_v23 }
  0x53   :  { %764 = vmatpush.msra.mxu3 %v2475_v13  ;;  %449 = vmatmul.f32.vlgmr.msrb.gmra.mxu1 %v2634_v21 }
  0x54   :  { %618 = vmatpush.msra.mxu0 %v2565_v48  ;;  %656 = vmatpush.msra.mxu1 %v2475_v13  ;;  %v68_v13 = vld [vmem:[%s3692_s1 + $0x168] sm:$0xff] }
  0x55   :  { %711 = vmatpush.msra.mxu2 %v3769_v59  ;;  %766 = vmatpush.msra.mxu3 %v2491_v43  ;;  %v2829_v48 = vand.u32 4294901760, %v68_v13 }
  0x56   :  { %621 = vmatpush.msra.mxu0 %v2588_v15  ;;  %658 = vmatpush.msra.mxu1 %v2491_v43  ;;  %v67_v43 = vld [vmem:[%s3692_s1 + $0x160] sm:$0xff] }
  0x57   :  { %715 = vmatpush.msra.mxu2 %v3770_v33  ;;  %768 = vmatpush.msra.mxu3 %v2507_v51  ;;  %v2842_v15 = vand.u32 4294901760, %v67_v43 }
  0x58   :  { %624 = vmatpush.msra.mxu0 %v2603_v45  ;;  %660 = vmatpush.msra.mxu1 %v2507_v51  ;;  %v69_v51 = vld [vmem:[%s3692_s1 + $0x170] sm:$0xff] }
  0x59   :  { %719 = vmatpush.msra.mxu2 %v3771_v31  ;;  %770 = vmatpush.msra.mxu3 %v2517_v62  ;;  %v65_v45 = vld [vmem:[%s3692_s1 + $0x150] sm:$0xff] }
  0x5a   :  { %627 = vmatpush.msra.mxu0 %v2616_v49  ;;  %662 = vmatpush.msra.mxu1 %v2517_v62  ;;  %v2832_v62 = vsub.f32 %v70_v23, %v2809_v39  ;;  %v2859_v49 = vsub.f32 %v68_v13, %v2829_v48  ;;  %v56_v13 = vld [vmem:[%s3692_s1 + $0x108] sm:$0xff] }
  0x5b   :  { %723 = vmatpush.msra.mxu2 %v3772_v24  ;;  %772 = vmatpush.msra.mxu3 %v2532_v27  ;;  %v2994_v24 = vand.u32 4294901760, %v57_v44 }
  0x5c   :  { %630 = vmatpush.msra.mxu0 %v2632_v1  ;;  %664 = vmatpush.msra.mxu1 %v2532_v27  ;;  %v2819_v27 = vand.u32 4294901760, %v69_v51  ;;  %v2863_v1 = vand.u32 4294901760, %v65_v45 }
  0x5d   :  { %727 = vmatpush.msra.mxu2 %v3773_v32  ;;  %774 = vmatpush.msra.mxu3 %v2559_v22  ;;  %v2998_v32 = vsub.f32 %v59_v28, %v2965_v50 }
  0x5e   :  { %633 = vmatpush.msra.mxu0 %v2650_v29  ;;  %666 = vmatpush.msra.mxu1 %v2559_v22  ;;  %v66_v22 = vld [vmem:[%s3692_s1 + $0x158] sm:$0xff]  ;;  %v63_v29 = vld [vmem:[%s3692_s1 + $0x140] sm:$0xff] }
  0x5f   :  { %731 = vmatpush.msra.mxu2 %v556_v18  ;;  %776 = vmatpush.msra.mxu3 %v2575_v61  ;;  %v2852_v14 = vand.u32 4294901760, %v66_v22  ;;  %v2873_v18 = vsub.f32 %v67_v43, %v2842_v15  ;;  %v3006_v43 = vsub.f32 %v102_v47, %v2976_v26 }
  0x60   :  { %636 = vmatpush.msra.mxu0 %v2677_v5  ;;  %668 = vmatpush.msra.mxu1 %v2575_v61  ;;  %v2845_v61 = vsub.f32 %v69_v51, %v2819_v27  ;;  %v2895_v5 = vsub.f32 %v65_v45, %v2863_v1 }
  0x61   :  { %735 = vmatpush.msra.mxu2 %v562_v4  ;;  %778 = vmatpush.msra.mxu3 %v2590_v16  ;;  %v3734_v9 = vand.u32 4294901760, %v2873_v18 }
  0x62   :  { %639 = vmatpush.msra.mxu0 %v2690_v38  ;;  %670 = vmatpush.msra.mxu1 %v2590_v16  ;;  %v837_v16 = vand.u32 4294901760, %v2832_v62  ;;  %v843_v21 = vand.u32 4294901760, %v2845_v61  ;;  %v3729_v25 = vand.u32 4294901760, %v2895_v5 }
  0x63   :  { %739 = vmatpush.msra.mxu2 %v568_v63  ;;  %780 = vmatpush.msra.mxu3 %v2605_v19  ;;  %v856_v40 = vsub.f32 %v2873_v18, %v3734_v9 }
  0x64   :  { %642 = vmatpush.msra.mxu0 %v2704_v53  ;;  %672 = vmatpush.msra.mxu1 %v2605_v19  ;;  %v64_v19 = vld [vmem:[%s3692_s1 + $0x148] sm:$0xff]  ;;  %v838_v4 = vsub.f32 %v2832_v62, %v837_v16  ;;  %v844_v38 = vsub.f32 %v2845_v61, %v843_v21  ;;  %v868_v54 = vsub.f32 %v2895_v5, %v3729_v25 }
  0x65   :  { %743 = vmatpush.msra.mxu2 %v574_v36  ;;  %782 = vmatpush.msra.mxu3 %v2618_v55  ;;  %v2889_v63 = vand.u32 4294901760, %v64_v19  ;;  %v2905_v36 = vand.u32 4294901760, %v63_v29  ;;  %v857_v41 = vand.u32 4294901760, %v856_v40 }
  0x66   :  { %645 = vmatmul.f32.vlgmr.msra.gmra.mxu0 %v2727_v20  ;;  %674 = vmatpush.msra.mxu1 %v2618_v55  ;;  %v2878_v55 = vsub.f32 %v66_v22, %v2852_v14  ;;  %v839_v3 = vand.u32 4294901760, %v838_v4  ;;  %v845_v2 = vand.u32 4294901760, %v844_v38  ;;  %v2954_v20 = vsub.f32 %v62_v37, %v2919_v52  ;;  %v86_v4 = vld [vmem:[%s3692_s1 + $0x1f8] sm:$0xff]  ;;  %v55_v38 = vld [vmem:[%s3692_s1 + $0x100] sm:$0xff] }
  0x67   :  { %795 = vmatpush.msrb.mxu0 %v2809_v39  ;;  %747 = vmatpush.msra.mxu2 %v580_v8  ;;  %v2938_v30 = vsub.f32 %v63_v29, %v2905_v36  ;;  %v869_v31 = vand.u32 4294901760, %v868_v54  ;;  %v3021_v37 = vand.u32 4294901760, %v56_v13  ;;  %v3037_v40 = vand.u32 4294901760, %v86_v4 }
  0x68   :  { %784 = vmatpush.msra.mxu3 %v2647_v6  ;;  %676 = vmatpush.msra.mxu1 %v2647_v6  ;;  %v849_v6 = vand.u32 4294901760, %v2859_v49  ;;  %v3731_v53 = vand.u32 4294901760, %v2878_v55  ;;  %v3725_v59 = vand.u32 4294901760, %v2954_v20  ;;  %v3046_v47 = vand.u32 4294901760, %v55_v38 }
  0x69   :  { %797 = vmatpush.msrb.mxu0 %v2819_v27  ;;  %751 = vmatpush.msra.mxu2 %v586_v10  ;;  %v2935_v10 = vand.u32 4294901760, %v61_v17  ;;  %v3726_v58 = vand.u32 4294901760, %v2938_v30 }
  0x6a   :  { %786 = vmatpush.msra.mxu3 %v2663_v34  ;;  %753 = vmatmul.f32.vlgmr.msra.gmra.mxu2 %v2709_v7  ;;  %v850_v8 = vsub.f32 %v2859_v49, %v849_v6  ;;  %v886_v45 = vsub.f32 %v2954_v20, %v3725_v59 }
  0x6b   :  { %799 = vmatpush.msrb.mxu0 %v2829_v48  ;;  %938 = vmatpush.msrb.mxu2 %v2832_v62  ;;  %v2969_v0 = vsub.f32 %v61_v17, %v2935_v10  ;;  %v880_v23 = vsub.f32 %v2938_v30, %v3726_v58  ;;  %v78_v62 = vld [vmem:[%s3692_s1 + $0x1b8] sm:$0xff] }
  0x6c   :  { %678 = vmatpush.msra.mxu1 %v2663_v34  ;;  %788 = vmatpush.msra.mxu3 %v2682_v46  ;;  %v2922_v34 = vsub.f32 %v64_v19, %v2889_v63  ;;  %v851_v60 = vand.u32 4294901760, %v850_v8  ;;  %v3721_v8 = vand.u32 4294901760, %v2998_v32  ;;  %v887_v28 = vand.u32 4294901760, %v886_v45 }
  0x6d   :  { %790 = vmatmul.f32.vlgmr.msra.gmra.mxu3 %v2709_v7  ;;  %801 = vmatpush.msrb.mxu0 %v2842_v15  ;;  %v60_v7 = vld [vmem:[%s3692_s1 + $0x128] sm:$0xff]  ;;  %v3724_v51 = vand.u32 4294901760, %v2969_v0  ;;  %v881_v17 = vand.u32 4294901760, %v880_v23  ;;  %v83_v23 = vld [vmem:[%s3692_s1 + $0x1e0] sm:$0xff] }
  0x6e   :  { %941 = vmatpush.msrb.mxu2 %v2845_v61  ;;  %991 = vmatpush.msrb.mxu3 %v2809_v39  ;;  %v2950_v35 = vand.u32 4294901760, %v60_v7  ;;  %v3728_v42 = vand.u32 4294901760, %v2922_v34  ;;  %v77_v61 = vld [vmem:[%s3692_s1 + $0x1b0] sm:$0xff] }
  0x6f   :  { %680 = vmatpush.msra.mxu1 %v2682_v46  ;;  %803 = vmatpush.msrb.mxu0 %v2852_v14  ;;  %v862_v46 = vsub.f32 %v2878_v55, %v3731_v53 }
  0x70   :  { %684 = vmatmul.f32.vlgmr.msra.gmra.mxu1 %v487_v11  ;;  %944 = vmatpush.msrb.mxu2 %v2859_v49  ;;  %v58_v11 = vld [vmem:[%s3692_s1 + $0x118] sm:$0xff]  ;;  %v874_v57 = vsub.f32 %v2922_v34, %v3728_v42  ;;  %v2986_v33 = vsub.f32 %v60_v7, %v2950_v35  ;;  %v3032_v7 = vsub.f32 %v57_v44, %v2994_v24 }
  0x71   :  { %840 = vmatpush.msrb.mxu1 %v839_v3  ;;  %993 = vmatpush.msrb.mxu3 %v2819_v27  ;;  %v863_v56 = vand.u32 4294901760, %v862_v46  ;;  %v2982_v12 = vand.u32 4294901760, %v58_v11  ;;  %v892_v3 = vsub.f32 %v2969_v0, %v3724_v51  ;;  %v85_v46 = vld [vmem:[%s3692_s1 + $0x1f0] sm:$0xff]  ;;  %v904_v44 = vsub.f32 %v2998_v32, %v3721_v8 }
  0x72   :  { %805 = vmatpush.msrb.mxu0 %v2863_v1  ;;  %947 = vmatpush.msrb.mxu2 %v2873_v18  ;;  %v875_v22 = vand.u32 4294901760, %v874_v57  ;;  %v3722_v19 = vand.u32 4294901760, %v2986_v33  ;;  %v3727_v57 = vand.u32 4294901760, %v3032_v7 }
  0x73   :  { %846 = vmatpush.msrb.mxu1 %v845_v2  ;;  %995 = vmatpush.msrb.mxu3 %v2829_v48  ;;  %v3014_v29 = vsub.f32 %v58_v11, %v2982_v12  ;;  %v828_v2 = vand.u32 4294901760, %v3006_v43  ;;  %v3052_v11 = vsub.f32 %v56_v13, %v3021_v37 }
  0x74   :  { %807 = vmatpush.msrb.mxu0 %v2889_v63  ;;  %950 = vmatpush.msrb.mxu2 %v2878_v55 }
  0x75   :  { %852 = vmatpush.msrb.mxu1 %v851_v60  ;;  %997 = vmatpush.msrb.mxu3 %v2842_v15  ;;  %v898_v60 = vsub.f32 %v2986_v33, %v3722_v19  ;;  %v3723_v54 = vand.u32 4294901760, %v3014_v29  ;;  %v829_v13 = vsub.f32 %v3006_v43, %v828_v2  ;;  %v82_v19 = vld [vmem:[%s3692_s1 + $0x1d8] sm:$0xff] }
  0x76   :  { %809 = vmatpush.msrb.mxu0 %v2905_v36  ;;  %953 = vmatpush.msrb.mxu2 %v2895_v5  ;;  %v3102_v58 = vand.u32 4294901760, %v82_v19 }
  0x77   :  { %858 = vmatpush.msrb.mxu1 %v857_v41  ;;  %999 = vmatpush.msrb.mxu3 %v2852_v14  ;;  %v84_v41 = vld [vmem:[%s3692_s1 + $0x1e8] sm:$0xff]  ;;  %v899_v45 = vand.u32 4294901760, %v898_v60  ;;  %v905_v60 = vand.u32 4294901760, %v904_v44  ;;  %v830_v51 = vand.u32 4294901760, %v829_v13 }
  0x78   :  { %811 = vmatpush.msrb.mxu0 %v2919_v52  ;;  %956 = vmatpush.msrb.mxu2 %v2922_v34  ;;  %v3082_v8 = vand.u32 4294901760, %v84_v41 }
  0x79   :  { %864 = vmatpush.msrb.mxu1 %v863_v56  ;;  %1001 = vmatpush.msrb.mxu3 %v2863_v1  ;;  %v893_v56 = vand.u32 4294901760, %v892_v3  ;;  %v3080_v3 = vsub.f32 %v55_v38, %v3046_v47  ;;  %v916_v38 = vsub.f32 %v3032_v7, %v3727_v57 }
  0x7a   :  { %813 = vmatpush.msrb.mxu0 %v2935_v10  ;;  %959 = vmatpush.msrb.mxu2 %v2938_v30  ;;  %v3110_v57 = vsub.f32 %v84_v41, %v3082_v8 }
  0x7b   :  { %870 = vmatpush.msrb.mxu1 %v869_v31  ;;  %1003 = vmatpush.msrb.mxu3 %v2889_v63  ;;  %v3062_v31 = vand.u32 4294901760, %v85_v46  ;;  %v917_v41 = vand.u32 4294901760, %v916_v38 }
  0x7c   :  { %815 = vmatpush.msrb.mxu0 %v2950_v35  ;;  %962 = vmatpush.msrb.mxu2 %v2954_v20  ;;  %v3735_v38 = vand.u32 4294901760, %v3110_v57 }
  0x7d   :  { %876 = vmatpush.msrb.mxu1 %v875_v22  ;;  %1005 = vmatpush.msrb.mxu3 %v2905_v36  ;;  %v3073_v22 = vsub.f32 %v86_v4, %v3037_v40  ;;  %v3730_v4 = vand.u32 4294901760, %v3052_v11 }
  0x7e   :  { %817 = vmatpush.msrb.mxu0 %v2965_v50  ;;  %965 = vmatpush.msrb.mxu2 %v2969_v0 }
  0x7f   :  { %882 = vmatpush.msrb.mxu1 %v881_v17  ;;  %1007 = vmatpush.msrb.mxu3 %v2919_v52  ;;  %v910_v17 = vsub.f32 %v3014_v29, %v3723_v54  ;;  %v3097_v54 = vsub.f32 %v85_v46, %v3062_v31  ;;  %v3732_v59 = vand.u32 4294901760, %v3073_v22  ;;  %v3733_v46 = vand.u32 4294901760, %v3080_v3 }
  0x80   :  { %819 = vmatpush.msrb.mxu0 %v2982_v12  ;;  %968 = vmatpush.msrb.mxu2 %v2986_v33  ;;  %v922_v13 = vsub.f32 %v3052_v11, %v3730_v4  ;;  %v3132_v4 = vsub.f32 %v82_v19, %v3102_v58 }
  0x81   :  { %888 = vmatpush.msrb.mxu1 %v887_v28  ;;  %1009 = vmatpush.msrb.mxu3 %v2935_v10  ;;  %v3090_v28 = vand.u32 4294901760, %v83_v23  ;;  %v911_v44 = vand.u32 4294901760, %v910_v17  ;;  %v3736_v17 = vand.u32 4294901760, %v3097_v54 }
  0x82   :  { %821 = vmatpush.msrb.mxu0 %v2994_v24  ;;  %971 = vmatpush.msrb.mxu2 %v2998_v32  ;;  %v923_v19 = vand.u32 4294901760, %v922_v13  ;;  %v3738_v9 = vand.u32 4294901760, %v3132_v4 }
  0x83   :  { %894 = vmatpush.msrb.mxu1 %v893_v56  ;;  %1011 = vmatpush.msrb.mxu3 %v2950_v35  ;;  %v81_v56 = vld [vmem:[%s3692_s1 + $0x1d0] sm:$0xff]  ;;  %v3118_v42 = vsub.f32 %v83_v23, %v3090_v28  ;;  %v1179_v23 = vsub.f32 %v3073_v22, %v3732_v59 }
  0x84   :  { %823 = vmatpush.msrb.mxu0 %v3021_v37  ;;  %974 = vmatpush.msrb.mxu2 %v3014_v29  ;;  %v3125_v25 = vand.u32 4294901760, %v81_v56 }
  0x85   :  { %900 = vmatpush.msrb.mxu1 %v899_v45  ;;  %1013 = vmatpush.msrb.mxu3 %v2965_v50  ;;  %v80_v45 = vld [vmem:[%s3692_s1 + $0x1c8] sm:$0xff]  ;;  %v3737_v59 = vand.u32 4294901760, %v3118_v42  ;;  %v1180_v13 = vand.u32 4294901760, %v1179_v23  ;;  %v3176_v23 = vand.u32 4294901760, %v78_v62 }
  0x86   :  { %825 = vmatpush.msrb.mxu0 %v3046_v47  ;;  %977 = vmatpush.msrb.mxu2 %v3032_v7  ;;  %v3143_v53 = vand.u32 4294901760, %v80_v45 }
  0x87   :  { %906 = vmatpush.msrb.mxu1 %v905_v60  ;;  %1015 = vmatpush.msrb.mxu3 %v2982_v12  ;;  %v79_v60 = vld [vmem:[%s3692_s1 + $0x1c0] sm:$0xff]  ;;  %v1197_v49 = vsub.f32 %v3118_v42, %v3737_v59  ;;  %v1203_v59 = vsub.f32 %v3132_v4, %v3738_v9 }
  0x88   :  { %831 = vmatmul.f32.vlgmr.msrb.gmra.mxu0 %v830_v51  ;;  %980 = vmatpush.msrb.mxu2 %v3052_v11  ;;  %v928_v51 = vsub.f32 %v3080_v3, %v3733_v46  ;;  %v3159_v46 = vand.u32 4294901760, %v79_v60 }
  0x89   :  { %1032 = vmatpush.msra.mxu0 %v837_v16  ;;  %912 = vmatpush.msrb.mxu1 %v911_v44  ;;  %v1185_v16 = vsub.f32 %v3097_v54, %v3736_v17  ;;  %v3157_v44 = vsub.f32 %v81_v56, %v3125_v25  ;;  %v1191_v56 = vsub.f32 %v3110_v57, %v3735_v38  ;;  %v3193_v17 = vand.u32 4294901760, %v77_v61 }
  0x8a   :  { %1017 = vmatpush.msrb.mxu3 %v2994_v24  ;;  %983 = vmatpush.msrb.mxu2 %v3080_v3  ;;  %v1204_v9 = vand.u32 4294901760, %v1203_v59  ;;  %v3777_v59 = vand.u32 4294901760, %v2922_v34  ;;  %v72_v34 = vld [vmem:[%s3692_s1 + $0x188] sm:$0xff] }
  0x8b   :  { %1036 = vmatpush.msra.mxu0 %v843_v21  ;;  %918 = vmatpush.msrb.mxu1 %v917_v41  ;;  %v929_v21 = vand.u32 4294901760, %v928_v51  ;;  %v3174_v41 = vsub.f32 %v80_v45, %v3143_v53  ;;  %v3774_v51 = vand.u32 4294901760, %v2873_v18  ;;  %v1186_v45 = vand.u32 4294901760, %v1185_v16  ;;  %v75_v18 = vld [vmem:[%s3692_s1 + $0x1a0] sm:$0xff] }
  0x8c   :  { %1019 = vmatpush.msrb.mxu3 %v3021_v37  ;;  %986 = vmatmul.f32.vlgmr.msrb.gmra.mxu2 %v3006_v43  ;;  %v3739_v38 = vand.u32 4294901760, %v3157_v44  ;;  %v3775_v43 = vand.u32 4294901760, %v2878_v55  ;;  %v3206_v16 = vsub.f32 %v78_v62, %v3176_v23 }
  0x8d   :  { %1040 = vmatpush.msra.mxu0 %v849_v6  ;;  %1136 = vmatpush.msra.mxu2 %v3037_v40  ;;  %v76_v6 = vld [vmem:[%s3692_s1 + $0x1a8] sm:$0xff] }
  0x8e   :  { %924 = vmatpush.msrb.mxu1 %v923_v19  ;;  %1021 = vmatpush.msrb.mxu3 %v3046_v47  ;;  %v3191_v19 = vsub.f32 %v79_v60, %v3159_v46  ;;  %v3740_v60 = vand.u32 4294901760, %v3174_v41  ;;  %v1209_v55 = vsub.f32 %v3157_v44, %v3739_v38 }
  0x8f   :  { %1025 = vmatmul.f32.vlgmr.msrb.gmra.mxu3 %v828_v2  ;;  %1044 = vmatpush.msra.mxu0 %v3774_v51  ;;  %v1192_v2 = vand.u32 4294901760, %v1191_v56  ;;  %v3208_v51 = vand.u32 4294901760, %v76_v6  ;;  %v3221_v56 = vsub.f32 %v77_v61, %v3193_v17 }
  0x90   :  { %1138 = vmatpush.msra.mxu2 %v3062_v31  ;;  %1181 = vmatpush.msra.mxu3 %v1180_v13  ;;  %v1198_v13 = vand.u32 4294901760, %v1197_v49  ;;  %v3741_v62 = vand.u32 4294901760, %v3191_v19  ;;  %v3776_v49 = vand.u32 4294901760, %v2895_v5  ;;  %v73_v5 = vld [vmem:[%s3692_s1 + $0x190] sm:$0xff] }
  0x91   :  { %930 = vmatpush.msrb.mxu1 %v929_v21  ;;  %1048 = vmatpush.msra.mxu0 %v3775_v43  ;;  %v74_v21 = vld [vmem:[%s3692_s1 + $0x198] sm:$0xff]  ;;  %v3223_v43 = vand.u32 4294901760, %v75_v18  ;;  %v3234_v61 = vsub.f32 %v76_v6, %v3208_v51 }
  0x92   :  { %932 = vmatmul.f32.vlgmr.msrb.gmra.mxu1 %v2976_v26  ;;  %1140 = vmatpush.msra.mxu2 %v3082_v8  ;;  %v3236_v38 = vand.u32 4294901760, %v74_v21  ;;  %v1221_v6 = vsub.f32 %v3191_v19, %v3741_v62 }
  0x93   :  { %1099 = vmatpush.msra.mxu1 %v2809_v39  ;;  %1187 = vmatpush.msra.mxu3 %v1186_v45  ;;  %v1215_v39 = vsub.f32 %v3174_v41, %v3740_v60  ;;  %v3742_v45 = vand.u32 4294901760, %v3206_v16  ;;  %v3778_v60 = vand.u32 4294901760, %v2938_v30  ;;  %v71_v30 = vld [vmem:[%s3692_s1 + $0x180] sm:$0xff] }
  0x94   :  { %1052 = vmatpush.msra.mxu0 %v3776_v49  ;;  %1142 = vmatpush.msra.mxu2 %v3090_v28  ;;  %v3250_v49 = vsub.f32 %v75_v18, %v3223_v43  ;;  %v3266_v62 = vsub.f32 %v74_v21, %v3236_v38 }
  0x95   :  { %1101 = vmatpush.msra.mxu1 %v2819_v27  ;;  %1193 = vmatpush.msra.mxu3 %v1192_v2  ;;  %v1210_v27 = vand.u32 4294901760, %v1209_v55  ;;  %v3743_v2 = vand.u32 4294901760, %v3221_v56  ;;  %v1227_v18 = vsub.f32 %v3206_v16, %v3742_v45  ;;  %v3780_v55 = vand.u32 4294901760, %v2969_v0 }
  0x96   :  { %1056 = vmatpush.msra.mxu0 %v3777_v59  ;;  %1144 = vmatpush.msra.mxu2 %v3102_v58  ;;  %v103_v59 = vld.sshfl [vmem:[#allocation1 + $0x18] sm:$0xff pattern:$0x73625140]  ;;  %v1244_v45 = vand.u32 4294901760, %v3250_v49  ;;  %v3782_v0 = vand.u32 4294901760, %v2986_v33 }
  0x97   :  { %1103 = vmatpush.msra.mxu1 %v2829_v48  ;;  %1199 = vmatpush.msra.mxu3 %v1198_v13  ;;  %v3258_v48 = vand.u32 4294901760, %v73_v5  ;;  %v1216_v13 = vand.u32 4294901760, %v1215_v39  ;;  %v1222_v39 = vand.u32 4294901760, %v1221_v6  ;;  %v1233_v21 = vsub.f32 %v3221_v56, %v3743_v2 }
  0x98   :  { %1060 = vmatpush.msra.mxu0 %v3778_v60  ;;  %1146 = vmatpush.msra.mxu2 %v3125_v25  ;;  %v3779_v60 = vand.u32 4294901760, %v2954_v20  ;;  %v1250_v2 = vand.u32 4294901760, %v3266_v62 }
  0x99   :  { %1105 = vmatpush.msra.mxu1 %v2842_v15  ;;  %1205 = vmatpush.msra.mxu3 %v1204_v9  ;;  %v3274_v15 = vand.u32 4294901760, %v72_v34  ;;  %v3276_v9 = vand.u32 4294901760, %v103_v59  ;;  %v3287_v20 = vsub.f32 %v73_v5, %v3258_v48 }
  0x9a   :  { %1064 = vmatpush.msra.mxu0 %v3779_v60  ;;  %1148 = vmatpush.msra.mxu2 %v3143_v53  ;;  %v3289_v60 = vand.u32 4294901760, %v71_v30 }
  0x9b   :  { %1107 = vmatpush.msra.mxu1 %v2852_v14  ;;  %1211 = vmatpush.msra.mxu3 %v1210_v27  ;;  %v1228_v14 = vand.u32 4294901760, %v1227_v18  ;;  %v3781_v27 = vand.u32 4294901760, %v3234_v61  ;;  %v3300_v5 = vsub.f32 %v72_v34, %v3274_v15  ;;  %v3783_v18 = vand.u32 4294901760, %v2998_v32 }
  0x9c   :  { %1068 = vmatpush.msra.mxu0 %v3780_v55  ;;  %1150 = vmatpush.msra.mxu2 %v3159_v46  ;;  %v3303_v55 = vsub.f32 %v103_v59, %v3276_v9  ;;  %v1256_v33 = vand.u32 4294901760, %v3287_v20  ;;  %v3314_v34 = vsub.f32 %v71_v30, %v3289_v60  ;;  %v1251_v59 = vsub.f32 %v3266_v62, %v1250_v2 }
  0x9d   :  { %1109 = vmatpush.msra.mxu1 %v2863_v1  ;;  %1217 = vmatpush.msra.mxu3 %v1216_v13  ;;  %v1239_v6 = vsub.f32 %v3234_v61, %v3781_v27  ;;  %v1234_v1 = vand.u32 4294901760, %v1233_v21  ;;  %v1245_v13 = vsub.f32 %v3250_v49, %v1244_v45  ;;  %v1262_v32 = vand.u32 4294901760, %v3300_v5 }
  0x9e   :  { %1072 = vmatpush.msra.mxu0 %v3782_v0  ;;  %1152 = vmatpush.msra.mxu2 %v3176_v23  ;;  %v1169_v21 = vand.u32 4294901760, %v3303_v55  ;;  %v1252_v27 = vand.u32 4294901760, %v1251_v59 }
  0x9f   :  { %1111 = vmatpush.msra.mxu1 %v2889_v63  ;;  %1223 = vmatpush.msra.mxu3 %v1222_v39  ;;  %v1240_v63 = vand.u32 4294901760, %v1239_v6  ;;  %v3784_v39 = vand.u32 4294901760, %v3014_v29  ;;  %v1246_v30 = vand.u32 4294901760, %v1245_v13  ;;  %v1257_v29 = vsub.f32 %v3287_v20, %v1256_v33 }
  0xa0   :  { %1076 = vmatpush.msra.mxu0 %v3783_v18  ;;  %1154 = vmatpush.msra.mxu2 %v3193_v17  ;;  %v3786_v6 = vand.u32 4294901760, %v3052_v11  ;;  %v3788_v13 = vand.u32 4294901760, %v3073_v22 }
  0xa1   :  { %1113 = vmatpush.msra.mxu1 %v2905_v36  ;;  %1229 = vmatpush.msra.mxu3 %v1228_v14  ;;  %v3785_v36 = vand.u32 4294901760, %v3032_v7  ;;  %v1268_v14 = vand.u32 4294901760, %v3314_v34  ;;  %v1170_v7 = vsub.f32 %v3303_v55, %v1169_v21  ;;  %v1258_v11 = vand.u32 4294901760, %v1257_v29 }
  0xa2   :  { %1080 = vmatpush.msra.mxu0 %v3784_v39  ;;  %1156 = vmatpush.msra.mxu2 %v3208_v51 }
  0xa3   :  { %1115 = vmatpush.msra.mxu1 %v2919_v52  ;;  %1235 = vmatpush.msra.mxu3 %v1234_v1  ;;  %v1263_v52 = vsub.f32 %v3300_v5, %v1262_v32  ;;  %v1269_v0 = vsub.f32 %v3314_v34, %v1268_v14 }
  0xa4   :  { %1084 = vmatpush.msra.mxu0 %v3785_v36  ;;  %1158 = vmatpush.msra.mxu2 %v3223_v43 }
  0xa5   :  { %1117 = vmatpush.msra.mxu1 %v2935_v10  ;;  %1241 = vmatpush.msra.mxu3 %v1240_v63  ;;  %v3787_v10 = vand.u32 4294901760, %v3080_v3  ;;  %v1264_v1 = vand.u32 4294901760, %v1263_v52  ;;  %v22_v3 = vld [vmem:[%s3691_s0 + $0x8] sm:$0x3] }
  0xa6   :  { %1088 = vmatpush.msra.mxu0 %v3786_v6  ;;  %1160 = vmatpush.msra.mxu2 %v3236_v38  ;;  %99 = vst [vmem:[#allocation1 + $0x20] ss:$4 sm:$0xff] %v22_v3 }
  0xa7   :  { %1119 = vmatpush.msra.mxu1 %v2950_v35  ;;  %1247 = vmatpush.msra.mxu3 %v1246_v30  ;;  %v1171_v35 = vand.u32 4294901760, %v1170_v7 }
  0xa8   :  { %1092 = vmatpush.msra.mxu0 %v3787_v10  ;;  %1162 = vmatpush.msra.mxu2 %v3258_v48 }
  0xa9   :  { %1121 = vmatpush.msra.mxu1 %v2965_v50  ;;  %1253 = vmatpush.msra.mxu3 %v1252_v27  ;;  %v1270_v50 = vand.u32 4294901760, %v1269_v0 }
  0xaa   :  { %1094 = vmatmul.f32.vlgmr.msra.gmra.mxu0 %v2976_v26  ;;  %1164 = vmatpush.msra.mxu2 %v3274_v15 }
  0xab   :  { %1279 = vmatpush.msrb.mxu0 %v3073_v22  ;;  %1123 = vmatpush.msra.mxu1 %v2982_v12  ;;  %v3789_v12 = vand.u32 4294901760, %v3097_v54 }
  0xac   :  { %1259 = vmatpush.msra.mxu3 %v1258_v11  ;;  %1166 = vmatpush.msra.mxu2 %v3289_v60 }
  0xad   :  { %1282 = vmatpush.msrb.mxu0 %v3097_v54  ;;  %1125 = vmatpush.msra.mxu1 %v2994_v24  ;;  %v3790_v24 = vand.u32 4294901760, %v3110_v57  ;;  %v3797_v54 = vand.u32 4294901760, %v3221_v56  ;;  %v104_v22 = vld.sshfl [vmem:[#allocation1 + $0x20] sm:$0xff pattern:$0x73625140] }
  0xae   :  { %1265 = vmatpush.msra.mxu3 %v1264_v1  ;;  %1172 = vmatmul.f32.vlgmr.msra.gmra.mxu2 %v1171_v35 }
  0xaf   :  { %1285 = vmatpush.msrb.mxu0 %v3110_v57  ;;  %1373 = vmatpush.msrb.mxu2 %v3788_v13 }
  0xb0   :  { %1127 = vmatpush.msra.mxu1 %v3021_v37  ;;  %1271 = vmatpush.msra.mxu3 %v1270_v50  ;;  %v3791_v37 = vand.u32 4294901760, %v3118_v42 }
  0xb1   :  { %1273 = vmatmul.f32.vlgmr.msra.gmra.mxu3 %v3276_v9  ;;  %1288 = vmatpush.msrb.mxu0 %v3118_v42  ;;  %v3794_v42 = vand.u32 4294901760, %v3174_v41 }
  0xb2   :  { %1377 = vmatpush.msrb.mxu2 %v3789_v12  ;;  %1440 = vmatpush.msrb.mxu3 %v3037_v40 }
  0xb3   :  { %1129 = vmatpush.msra.mxu1 %v3046_v47  ;;  %1291 = vmatpush.msrb.mxu0 %v3132_v4  ;;  %v3796_v47 = vand.u32 4294901760, %v3206_v16 }
  0xb4   :  { %1131 = vmatmul.f32.vlgmr.msra.gmra.mxu1 %v2976_v26  ;;  %1381 = vmatpush.msrb.mxu2 %v3790_v24  ;;  %v3792_v26 = vand.u32 4294901760, %v3132_v4 }
  0xb5   :  { %1332 = vmatpush.msrb.mxu1 %v3037_v40  ;;  %1442 = vmatpush.msrb.mxu3 %v3062_v31  ;;  %v3793_v40 = vand.u32 4294901760, %v3157_v44 }
  0xb6   :  { %1294 = vmatpush.msrb.mxu0 %v3157_v44  ;;  %1385 = vmatpush.msrb.mxu2 %v3791_v37 }
  0xb7   :  { %1334 = vmatpush.msrb.mxu1 %v3062_v31  ;;  %1444 = vmatpush.msrb.mxu3 %v3082_v8  ;;  %v92_v31 = vld [vmem:[%s3692_s1 + $0x228] sm:$0xff] }
  0xb8   :  { %1297 = vmatpush.msrb.mxu0 %v3174_v41  ;;  %1389 = vmatpush.msrb.mxu2 %v3792_v26  ;;  %v110_v41 = vsel %vm109_vm0, %v104_v22, 0 }
  0xb9   :  { %1336 = vmatpush.msrb.mxu1 %v3082_v8  ;;  %1446 = vmatpush.msrb.mxu3 %v3090_v28  ;;  %v3795_v8 = vand.u32 4294901760, %v3191_v19 }
  0xba   :  { %1300 = vmatpush.msrb.mxu0 %v3191_v19  ;;  %1393 = vmatpush.msrb.mxu2 %v3793_v40 }
  0xbb   :  { %1338 = vmatpush.msrb.mxu1 %v3090_v28  ;;  %1448 = vmatpush.msrb.mxu3 %v3102_v58  ;;  %v91_v28 = vld [vmem:[%s3692_s1 + $0x220] sm:$0xff] }
  0xbc   :  { %1303 = vmatpush.msrb.mxu0 %v3206_v16  ;;  %1397 = vmatpush.msrb.mxu2 %v3794_v42  ;;  %v89_v16 = vld [vmem:[%s3692_s1 + $0x210] sm:$0xff]  ;;  %v150_v37 = vpop.f32.mrf.mxu0 }
  0xbd   :  { %1340 = vmatpush.msrb.mxu1 %v3102_v58  ;;  %1450 = vmatpush.msrb.mxu3 %v3125_v25  ;;  %v94_v58 = vld [vmem:[%s3692_s1 + $0x238] sm:$0xff] }
  0xbe   :  { %1306 = vmatpush.msrb.mxu0 %v3221_v56  ;;  %1401 = vmatpush.msrb.mxu2 %v3795_v8  ;;  %v3418_v57 = vand.u32 4294901760, %v94_v58 }
  0xbf   :  { %1342 = vmatpush.msrb.mxu1 %v3125_v25  ;;  %1452 = vmatpush.msrb.mxu3 %v3143_v53  ;;  %v93_v25 = vld [vmem:[%s3692_s1 + $0x230] sm:$0xff] }
  0xc0   :  { %1309 = vmatpush.msrb.mxu0 %v3234_v61  ;;  %1405 = vmatpush.msrb.mxu2 %v3796_v47  ;;  %v3428_v4 = vand.u32 4294901760, %v93_v25  ;;  %v3441_v44 = vsub.f32 %v94_v58, %v3418_v57 }
  0xc1   :  { %1344 = vmatpush.msrb.mxu1 %v3143_v53  ;;  %1454 = vmatpush.msrb.mxu3 %v3159_v46  ;;  %v3798_v53 = vand.u32 4294901760, %v3234_v61  ;;  %v88_v61 = vld [vmem:[%s3692_s1 + $0x208] sm:$0xff] }
  0xc2   :  { %1312 = vmatpush.msrb.mxu0 %v3250_v49  ;;  %1409 = vmatpush.msrb.mxu2 %v3797_v54  ;;  %v3455_v19 = vsub.f32 %v93_v25, %v3428_v4  ;;  %v1519_v56 = vand.u32 4294901760, %v3441_v44 }
  0xc3   :  { %1346 = vmatpush.msrb.mxu1 %v3159_v46  ;;  %1456 = vmatpush.msrb.mxu3 %v3176_v23  ;;  %v3438_v46 = vand.u32 4294901760, %v92_v31 }
  0xc4   :  { %1315 = vmatpush.msrb.mxu0 %v3266_v62  ;;  %1413 = vmatpush.msrb.mxu2 %v3798_v53  ;;  %v3463_v62 = vand.u32 4294901760, %v110_v41 }
  0xc5   :  { %1348 = vmatpush.msrb.mxu1 %v3176_v23  ;;  %1458 = vmatpush.msrb.mxu3 %v3193_v17  ;;  %v90_v23 = vld [vmem:[%s3692_s1 + $0x218] sm:$0xff] }
  0xc6   :  { %1318 = vmatpush.msrb.mxu0 %v3287_v20  ;;  %1417 = vmatpush.msrb.mxu2 %v1244_v45  ;;  %v3471_v45 = vsub.f32 %v92_v31, %v3438_v46  ;;  %v3491_v20 = vsub.f32 %v110_v41, %v3463_v62  ;;  %v251_v24 = vpop.f32.mrf.mxu1 }
  0xc7   :  { %1350 = vmatpush.msrb.mxu1 %v3193_v17  ;;  %1460 = vmatpush.msrb.mxu3 %v3208_v51  ;;  %v3452_v17 = vand.u32 4294901760, %v91_v28  ;;  %v252_v26 = vadd.f32 %v251_v24, %v150_v37 }
  0xc8   :  { %1321 = vmatpush.msrb.mxu0 %v3300_v5  ;;  %1421 = vmatpush.msrb.mxu2 %v1250_v2  ;;  %v1525_v2 = vand.u32 4294901760, %v3455_v19  ;;  %v3498_v5 = vand.u32 4294901760, %v88_v61  ;;  %v1531_v18 = vand.u32 4294901760, %v3471_v45  ;;  %v305_v40 = vpop.f32.mrf.mxu2  ;;  %v344_v8 = vpop.f32.mrf.mxu3 }
  0xc9   :  { %1352 = vmatpush.msrb.mxu1 %v3208_v51  ;;  %1462 = vmatpush.msrb.mxu3 %v3223_v43  ;;  %v3467_v51 = vand.u32 4294901760, %v90_v23  ;;  %v3485_v49 = vsub.f32 %v91_v28, %v3452_v17  ;;  %v306_v42 = vadd.f32 %v305_v40, %v252_v26 }
  0xca   :  { %1324 = vmatpush.msrb.mxu0 %v3314_v34  ;;  %1425 = vmatpush.msrb.mxu2 %v1256_v33  ;;  %v87_v34 = vld [vmem:[%s3692_s1 + $0x200] sm:$0xff]  ;;  %v1532_v36 = vsub.f32 %v3471_v45, %v1531_v18 }
  0xcb   :  { %1354 = vmatpush.msrb.mxu1 %v3223_v43  ;;  %1464 = vmatpush.msrb.mxu3 %v3236_v38  ;;  %v3481_v43 = vand.u32 4294901760, %v89_v16  ;;  %v3502_v33 = vsub.f32 %v90_v23, %v3467_v51  ;;  %v1537_v63 = vand.u32 4294901760, %v3485_v49  ;;  %v3520_v39 = vand.u32 4294901760, %v87_v34 }
  0xcc   :  { %1327 = vmatmul.f32.vlgmr.msrb.gmra.mxu0 %v3303_v55  ;;  %1429 = vmatpush.msrb.mxu2 %v1262_v32  ;;  %v1502_v32 = vand.u32 4294901760, %v3491_v20  ;;  %v345_v47 = vadd.f32 %v344_v8, %v306_v42 }
  0xcd   :  { %1485 = vmatpush.msra.mxu0 %v3418_v57  ;;  %1356 = vmatpush.msrb.mxu1 %v3236_v38  ;;  %v1520_v38 = vsub.f32 %v3441_v44, %v1519_v56  ;;  %v3516_v59 = vsub.f32 %v89_v16, %v3481_v43  ;;  %v1543_v29 = vand.u32 4294901760, %v3502_v33  ;;  %v1560_v52 = vsub.f32 %v87_v34, %v3520_v39  ;;  %v413_v58 = vpop.f32.mrf.mxu0 }
  0xce   :  { %1466 = vmatpush.msrb.mxu3 %v3258_v48  ;;  %1433 = vmatpush.msrb.mxu2 %v1268_v14  ;;  %v1554_v14 = vsub.f32 %v88_v61, %v3498_v5  ;;  %v1503_v6 = vsub.f32 %v3491_v20, %v1502_v32  ;;  %v414_v54 = vadd.f32 %v413_v58, %v345_v47 }
  0xcf   :  { %1487 = vmatpush.msra.mxu0 %v3428_v4  ;;  %1358 = vmatpush.msrb.mxu1 %v3258_v48  ;;  %v1526_v48 = vsub.f32 %v3455_v19, %v1525_v2  ;;  %v1521_v30 = vand.u32 4294901760, %v1520_v38  ;;  %v1549_v27 = vand.u32 4294901760, %v3516_v59  ;;  %v1544_v7 = vsub.f32 %v3502_v33, %v1543_v29 }
  0xd0   :  { %1468 = vmatpush.msrb.mxu3 %v3274_v15  ;;  %1435 = vmatmul.f32.vlgmr.msrb.gmra.mxu2 %v3276_v9  ;;  %v1555_v10 = vand.u32 4294901760, %v1554_v14  ;;  %v1504_v11 = vand.u32 4294901760, %v1503_v6  ;;  %v1561_v0 = vand.u32 4294901760, %v1560_v52  ;;  %v450_v25 = vpop.f32.mrf.mxu1 }
  0xd1   :  { %1489 = vmatpush.msra.mxu0 %v3438_v46  ;;  %1580 = vmatpush.msra.mxu2 %v3441_v44  ;;  %v1545_v1 = vand.u32 4294901760, %v1544_v7  ;;  %v491_v53 = vpop.f32.mrf.mxu2 }
  0xd2   :  { %1360 = vmatpush.msrb.mxu1 %v3274_v15  ;;  %1470 = vmatpush.msrb.mxu3 %v3289_v60  ;;  %v1527_v15 = vand.u32 4294901760, %v1526_v48  ;;  %v1556_v35 = vsub.f32 %v1554_v14, %v1555_v10  ;;  %v1562_v50 = vsub.f32 %v1560_v52, %v1561_v0 }
  0xd3   :  { %1472 = vmatmul.f32.vlgmr.msrb.gmra.mxu3 %v3276_v9  ;;  %1491 = vmatpush.msra.mxu0 %v3452_v17  ;;  %v1538_v9 = vsub.f32 %v3485_v49, %v1537_v63 }
  0xd4   :  { %1583 = vmatpush.msra.mxu2 %v3455_v19  ;;  %1617 = vmatpush.msra.mxu3 %v3418_v57  ;;  %v1557_v13 = vand.u32 4294901760, %v1556_v35  ;;  %v1563_v12 = vand.u32 4294901760, %v1562_v50  ;;  %v592_v22 = vpop.f32.mrf.mxu3  ;;  %v1720_v19 = vld [vmem:[%s3693_s2 + $0x38] sm:$0xff] }
  0xd5   :  { %1362 = vmatpush.msrb.mxu1 %v3289_v60  ;;  %1493 = vmatpush.msra.mxu0 %v3467_v51  ;;  %v1533_v60 = vand.u32 4294901760, %v1532_v36  ;;  %v1539_v55 = vand.u32 4294901760, %v1538_v9 }
  0xd6   :  { %1366 = vmatmul.f32.vlgmr.msrb.gmra.mxu1 %v1169_v21  ;;  %1586 = vmatpush.msra.mxu2 %v3471_v45  ;;  %v1550_v21 = vsub.f32 %v3516_v59, %v1549_v27 }
  0xd7   :  { %1522 = vmatpush.msra.mxu1 %v1521_v30  ;;  %1619 = vmatpush.msra.mxu3 %v3428_v4 }
  0xd8   :  { %1495 = vmatpush.msra.mxu0 %v3481_v43  ;;  %1589 = vmatpush.msra.mxu2 %v3485_v49  ;;  %v1551_v3 = vand.u32 4294901760, %v1550_v21  ;;  %v1714_v21 = vld [vmem:[%s3693_s2 + $0x8] sm:$0xff] }
  0xd9   :  { %1528 = vmatpush.msra.mxu1 %v1527_v15  ;;  %1621 = vmatpush.msra.mxu3 %v3438_v46 }
  0xda   :  { %1497 = vmatpush.msra.mxu0 %v3498_v5  ;;  %1592 = vmatpush.msra.mxu2 %v3502_v33  ;;  %v1717_v33 = vld [vmem:[%s3693_s2 + $0x20] sm:$0xff] }
  0xdb   :  { %1534 = vmatpush.msra.mxu1 %v1533_v60  ;;  %1623 = vmatpush.msra.mxu3 %v3452_v17 }
  0xdc   :  { %1499 = vmatpush.msra.mxu0 %v3520_v39  ;;  %1595 = vmatpush.msra.mxu2 %v3516_v59  ;;  %v3615_v59 = vand.u32 4294901760, %v1717_v33 }
  0xdd   :  { %1540 = vmatpush.msra.mxu1 %v1539_v55  ;;  %1625 = vmatpush.msra.mxu3 %v3467_v51 }
  0xde   :  { %1505 = vmatmul.f32.vlgmr.msra.gmra.mxu0 %v1504_v11  ;;  %1598 = vmatpush.msra.mxu2 %v1554_v14  ;;  %v3628_v15 = vsub.f32 %v1717_v33, %v3615_v59 }
  0xdf   :  { %1650 = vmatpush.msrb.mxu0 %v1519_v56  ;;  %1546 = vmatpush.msra.mxu1 %v1545_v1 }
  0xe0   :  { %1627 = vmatpush.msra.mxu3 %v3481_v43  ;;  %1601 = vmatpush.msra.mxu2 %v1560_v52  ;;  %v1785_v60 = vand.u32 4294901760, %v3628_v15 }
  0xe1   :  { %1654 = vmatpush.msrb.mxu0 %v1525_v2  ;;  %1552 = vmatpush.msra.mxu1 %v1551_v3  ;;  %v1718_v2 = vld [vmem:[%s3693_s2 + $0x28] sm:$0xff]  ;;  %v3651_v3 = vand.u32 4294901760, %v1714_v21 }
  0xe2   :  { %1629 = vmatpush.msra.mxu3 %v3498_v5  ;;  %1604 = vmatmul.f32.vlgmr.msra.gmra.mxu2 %v3491_v20  ;;  %v1786_v1 = vsub.f32 %v3628_v15, %v1785_v60 }
  0xe3   :  { %1658 = vmatpush.msrb.mxu0 %v1531_v18  ;;  %1558 = vmatpush.msra.mxu1 %v1557_v13  ;;  %v1713_v13 = vld [vmem:[%s3693_s2] sm:$0xff]  ;;  %v1802_v26 = vsub.f32 %v1714_v21, %v3651_v3 }
  0xe4   :  { %1631 = vmatpush.msra.mxu3 %v3520_v39  ;;  %v1787_v24 = vand.u32 4294901760, %v1786_v1  ;;  %v1746_v40 = vand.u32 4294901760, %v1713_v13  ;;  %v1961_v1 = vld [vmem:[%s3694_s3] sm:$0xff] }
  0xe5   :  { %1635 = vmatmul.f32.vlgmr.msra.gmra.mxu3 %v1502_v32  ;;  %1662 = vmatpush.msrb.mxu0 %v1537_v63  ;;  %v1716_v32 = vld [vmem:[%s3693_s2 + $0x18] sm:$0xff] }
  0xe6   :  { %1564 = vmatpush.msra.mxu1 %v1563_v12  ;;  %v3632_v9 = vand.u32 4294901760, %v1716_v32 }
  0xe7   :  { %1566 = vmatmul.f32.vlgmr.msra.gmra.mxu1 %v3463_v62  ;;  %1666 = vmatpush.msrb.mxu0 %v1543_v29 }
  0xe8   :  { %1693 = vmatpush.msrb.mxu1 %v3418_v57  ;;  %v451_v57 = vadd.f32 %v450_v25, %v414_v54  ;;  %v1790_v55 = vsub.f32 %v1716_v32, %v3632_v9  ;;  %v1803_v54 = vand.u32 4294901760, %v1802_v26  ;;  %v1808_v25 = vsub.f32 %v1713_v13, %v1746_v40 }
  0xe9   :  { %1670 = vmatpush.msrb.mxu0 %v1549_v27  ;;  %v1715_v27 = vld [vmem:[%s3693_s2 + $0x10] sm:$0xff]  ;;  %v1991_v13 = vand.u32 4294901760, %v1961_v1 }
  0xea   :  { %1695 = vmatpush.msrb.mxu1 %v3428_v4  ;;  %v492_v31 = vadd.f32 %v491_v53, %v451_v57  ;;  %v646_v4 = vpop.f32.mrf.mxu0  ;;  %v3640_v7 = vand.u32 4294901760, %v1715_v27  ;;  %v1791_v50 = vand.u32 4294901760, %v1790_v55 }
  0xeb   :  { %1674 = vmatpush.msrb.mxu0 %v1555_v10 }
  0xec   :  { %1697 = vmatpush.msrb.mxu1 %v3438_v46  ;;  %v593_v28 = vadd.f32 %v592_v22, %v492_v31  ;;  %v1796_v35 = vsub.f32 %v1715_v27, %v3640_v7  ;;  %v1792_v8 = vsub.f32 %v1790_v55, %v1791_v50  ;;  %v1804_v22 = vsub.f32 %v1802_v26, %v1803_v54 }
  0xed   :  { %1678 = vmatpush.msrb.mxu0 %v1561_v0  ;;  %v685_v46 = vpop.f32.mrf.mxu1  ;;  %v754_v23 = vpop.f32.mrf.mxu2 }
  0xee   :  { %1699 = vmatpush.msrb.mxu1 %v3452_v17  ;;  %1680 = vmatmul.f32.vlgmr.msrb.gmra.mxu0 %v3463_v62  ;;  %v647_v44 = vadd.f32 %v646_v4, %v593_v28  ;;  %v1797_v37 = vand.u32 4294901760, %v1796_v35  ;;  %v1793_v53 = vand.u32 4294901760, %v1792_v8  ;;  %v1809_v4 = vand.u32 4294901760, %v1808_v25 }
  0xf0   :  { %1701 = vmatpush.msrb.mxu1 %v3467_v51  ;;  %v686_v41 = vadd.f32 %v685_v46, %v647_v44  ;;  %v791_v16 = vpop.f32.mrf.mxu3  ;;  %v1719_v51 = vld [vmem:[%s3693_s2 + $0x30] sm:$0xff]  ;;  %v1798_v58 = vsub.f32 %v1796_v35, %v1797_v37  ;;  %v1805_v44 = vand.u32 4294901760, %v1804_v22 }
  0xf1   :  { %v3589_v61 = vand.u32 4294901760, %v1719_v51 }
  0xf2   :  { %1703 = vmatpush.msrb.mxu1 %v3481_v43  ;;  %v755_v17 = vadd.f32 %v754_v23, %v686_v41  ;;  %v1799_v31 = vand.u32 4294901760, %v1798_v58  ;;  %v1810_v41 = vsub.f32 %v1808_v25, %v1809_v4 }
  0xf3   :  { %v3598_v38 = vsub.f32 %v1719_v51, %v3589_v61 }
  0xf4   :  { %1705 = vmatpush.msrb.mxu1 %v3498_v5  ;;  %v792_v43 = vadd.f32 %v791_v16, %v755_v17  ;;  %v3600_v5 = vand.u32 4294901760, %v1718_v2  ;;  %v1811_v23 = vand.u32 4294901760, %v1810_v41 }
  0xf5   :  { %v1773_v48 = vand.u32 4294901760, %v3598_v38 }
  0xf6   :  { %1707 = vmatpush.msrb.mxu1 %v3520_v39  ;;  %v3613_v63 = vsub.f32 %v1718_v2, %v3600_v5 }
  0xf7   :  { %1709 = vmatmul.f32.vlgmr.msrb.gmra.mxu1 %v3463_v62  ;;  %v3581_v62 = vand.u32 4294901760, %v1720_v19  ;;  %v1774_v29 = vsub.f32 %v3598_v38, %v1773_v48 }
  0xf8   :  { %v1779_v14 = vand.u32 4294901760, %v3613_v63 }
  0xf9   :  { %v3587_v45 = vsub.f32 %v1720_v19, %v3581_v62  ;;  %1733 = vmatpush.msrb.mxu2 %v3581_v62  ;;  %1865 = vmatpush.msra.mxu1 %v3581_v62  ;;  %v1775_v6 = vand.u32 4294901760, %v1774_v29 }
  0xfa   :  { %v1780_v52 = vsub.f32 %v3613_v63, %v1779_v14 }
  0xfb   :  { %v1767_v20 = vand.u32 4294901760, %v3587_v45  ;;  %1828 = vmatpush.msra.mxu0 %v3587_v45  ;;  %1735 = vmatpush.msrb.mxu2 %v3589_v61 }
  0xfc   :  { %1867 = vmatpush.msra.mxu1 %v3589_v61  ;;  %v1781_v0 = vand.u32 4294901760, %v1780_v52 }
  0xfd   :  { %v1768_v34 = vsub.f32 %v3587_v45, %v1767_v20  ;;  %1831 = vmatpush.msra.mxu0 %v3598_v38  ;;  %1737 = vmatpush.msrb.mxu2 %v3600_v5 }
  0xfe   :  { %1869 = vmatpush.msra.mxu1 %v3600_v5 }
  0xff   :  { %v1769_v36 = vand.u32 4294901760, %v1768_v34  ;;  %1834 = vmatpush.msra.mxu0 %v3613_v63  ;;  %1739 = vmatpush.msrb.mxu2 %v3615_v59 }
 0x100   :  { %1871 = vmatpush.msra.mxu1 %v3615_v59 }
 0x101   :  { %1770 = vmatpush.msrb.mxu3 %v1769_v36  ;;  %1837 = vmatpush.msra.mxu0 %v3628_v15 }
 0x102   :  { %1741 = vmatpush.msrb.mxu2 %v3632_v9  ;;  %1873 = vmatpush.msra.mxu1 %v3632_v9 }
 0x103   :  { %1776 = vmatpush.msrb.mxu3 %v1775_v6  ;;  %1840 = vmatpush.msra.mxu0 %v1790_v55  ;;  %v1964_v6 = vld [vmem:[%s3694_s3 + $0x18] sm:$0xff]  ;;  %v1962_v55 = vld [vmem:[%s3694_s3 + $0x8] sm:$0xff] }
 0x104   :  { %1743 = vmatpush.msrb.mxu2 %v3640_v7  ;;  %1875 = vmatpush.msra.mxu1 %v3640_v7  ;;  %v1985_v52 = vand.u32 4294901760, %v1964_v6 }
 0x105   :  { %v832_v56 = vpop.f32.mrf.mxu0  ;;  %1782 = vmatpush.msrb.mxu3 %v1781_v0  ;;  %1843 = vmatpush.msra.mxu0 %v1796_v35  ;;  %v1989_v0 = vand.u32 4294901760, %v1962_v55 }
 0x106   :  { %v833_v18 = vadd.f32 %v832_v56, %v792_v43  ;;  %1745 = vmatpush.msrb.mxu2 %v3651_v3  ;;  %1877 = vmatpush.msra.mxu1 %v3651_v3 }
 0x107   :  { %1788 = vmatpush.msrb.mxu3 %v1787_v24  ;;  %1846 = vmatpush.msra.mxu0 %v1802_v26  ;;  %v2033_v26 = vsub.f32 %v1961_v1, %v1991_v13 }
 0x108   :  { %1747 = vmatpush.msrb.mxu2 %v1746_v40  ;;  %1879 = vmatpush.msra.mxu1 %v1746_v40 }
 0x109   :  { %1794 = vmatpush.msrb.mxu3 %v1793_v53  ;;  %1849 = vmatpush.msra.mxu0 %v1808_v25  ;;  %v2034_v8 = vand.u32 4294901760, %v2033_v26 }
 0x10a   :  { %1898 = vmatpush.msra.mxu2 %v1767_v20 }
 0x10b   :  { %1800 = vmatpush.msrb.mxu3 %v1799_v31  ;;  %1986 = vmatpush.msrb.mxu0 %v1985_v52  ;;  %v2035_v58 = vsub.f32 %v2033_v26, %v2034_v8 }
 0x10c   :  { %1902 = vmatpush.msra.mxu2 %v1773_v48 }
 0x10d   :  { %1806 = vmatpush.msrb.mxu3 %v1805_v44 }
 0x10e   :  { %1906 = vmatpush.msra.mxu2 %v1779_v14 }
 0x10f   :  { %v933_v49 = vpop.f32.mrf.mxu1  ;;  %v987_v30 = vpop.f32.mrf.mxu2  ;;  %1812 = vmatpush.msrb.mxu3 %v1811_v23 }
 0x110   :  { %v934_v39 = vadd.f32 %v933_v49, %v833_v18  ;;  %1910 = vmatpush.msra.mxu2 %v1785_v60  ;;  %v1963_v60 = vld [vmem:[%s3694_s3 + $0x10] sm:$0xff] }
 0x111   :  { %1941 = vmatpush.msra.mxu3 %v3581_v62 }
 0x112   :  { %v988_v10 = vadd.f32 %v987_v30, %v934_v39  ;;  %v1026_v11 = vpop.f32.mrf.mxu3  ;;  %1914 = vmatpush.msra.mxu2 %v1791_v50  ;;  %v2027_v50 = vsub.f32 %v1962_v55, %v1989_v0 }
 0x113   :  { %1943 = vmatpush.msra.mxu3 %v3589_v61 }
 0x114   :  { %v1027_v42 = vadd.f32 %v1026_v11, %v988_v10  ;;  %1918 = vmatpush.msra.mxu2 %v1797_v37  ;;  %v1987_v10 = vand.u32 4294901760, %v1963_v60  ;;  %v2028_v37 = vand.u32 4294901760, %v2027_v50 }
 0x115   :  { %1945 = vmatpush.msra.mxu3 %v3600_v5 }
 0x116   :  { %1922 = vmatpush.msra.mxu2 %v1803_v54  ;;  %v2021_v11 = vsub.f32 %v1963_v60, %v1987_v10  ;;  %1988 = vmatpush.msrb.mxu0 %v1987_v10  ;;  %v2036_v54 = vand.u32 4294901760, %v2035_v58 }
 0x117   :  { %1947 = vmatpush.msra.mxu3 %v3615_v59 }
 0x118   :  { %1926 = vmatpush.msra.mxu2 %v1809_v4  ;;  %1990 = vmatpush.msrb.mxu0 %v1989_v0 }
 0x119   :  { %1949 = vmatpush.msra.mxu3 %v3632_v9 }
 0x11a   :  { %1992 = vmatpush.msrb.mxu0 %v1991_v13 }
 0x11b   :  { %1951 = vmatpush.msra.mxu3 %v3640_v7  ;;  %v2015_v7 = vsub.f32 %v1964_v6, %v1985_v52 }
 0x11d   :  { %1953 = vmatpush.msra.mxu3 %v3651_v3  ;;  %v2016_v21 = vand.u32 4294901760, %v2015_v7  ;;  %v2022_v3 = vand.u32 4294901760, %v2021_v11 }
 0x11f   :  { %1955 = vmatpush.msra.mxu3 %v1746_v40  ;;  %v2017_v35 = vsub.f32 %v2015_v7, %v2016_v21  ;;  %v2023_v24 = vsub.f32 %v2021_v11, %v2022_v3 }
 0x121   :  { %v2024_v40 = vand.u32 4294901760, %v2023_v24 }
 0x127   :  { %v1095_v12 = vpop.f32.mrf.mxu0 }
 0x128   :  { %v1096_v57 = vadd.f32 %v1095_v12, %v1027_v42  ;;  %v2018_v12 = vand.u32 4294901760, %v2017_v35  ;;  %v2029_v42 = vsub.f32 %v2027_v50, %v2028_v37 }
 0x12a   :  { %2019 = vmatpush.msrb.mxu1 %v2018_v12 }
 0x12c   :  { %2025 = vmatpush.msrb.mxu1 %v2024_v40 }
 0x131   :  { %v1132_v47 = vpop.f32.mrf.mxu1  ;;  %v1173_v46 = vpop.f32.mrf.mxu2 }
 0x132   :  { %v1133_v28 = vadd.f32 %v1132_v47, %v1096_v57  ;;  %v2030_v47 = vand.u32 4294901760, %v2029_v42 }
 0x134   :  { %v1174_v17 = vadd.f32 %v1173_v46, %v1133_v28  ;;  %v1274_v19 = vpop.f32.mrf.mxu3  ;;  %2031 = vmatpush.msrb.mxu1 %v2030_v47 }
 0x136   :  { %v1275_v51 = vadd.f32 %v1274_v19, %v1174_v17  ;;  %2037 = vmatpush.msrb.mxu1 %v2036_v54 }
 0x149   :  { %v1328_v16 = vpop.f32.mrf.mxu0 }
 0x14a   :  { %v1329_v45 = vadd.f32 %v1328_v16, %v1275_v51 }
 0x153   :  { %v1367_v56 = vpop.f32.mrf.mxu1  ;;  %v1436_v2 = vpop.f32.mrf.mxu2 }
 0x154   :  { %v1368_v43 = vadd.f32 %v1367_v56, %v1329_v45 }
 0x156   :  { %v1437_v49 = vadd.f32 %v1436_v2, %v1368_v43  ;;  %v1473_v20 = vpop.f32.mrf.mxu3  ;;  %v2176_v43 = vld [vmem:[%s3695_s4] ss:$0 sm:$0xff] }
 0x158   :  { %v1474_v62 = vadd.f32 %v1473_v20, %v1437_v49 }
 0x15b   :  { %v1506_v61 = vpop.f32.mrf.mxu0 }
 0x15c   :  { %v1507_v18 = vadd.f32 %v1506_v61, %v1474_v62 }
 0x164   :  { %v1567_v38 = vpop.f32.mrf.mxu1 }
 0x165   :  { %v1568_v5 = vadd.f32 %v1567_v38, %v1507_v18  ;;  %v1605_v33 = vpop.f32.mrf.mxu2 }
 0x167   :  { %v1606_v34 = vadd.f32 %v1605_v33, %v1568_v5 }
 0x168   :  { %v1636_v48 = vpop.f32.mrf.mxu3 }
 0x169   :  { %v1637_v63 = vadd.f32 %v1636_v48, %v1606_v34 }
 0x16b   :  { %v1681_v59 = vpop.f32.mrf.mxu0 }
 0x16c   :  { %v1682_v39 = vadd.f32 %v1681_v59, %v1637_v63 }
 0x174   :  { %v1710_v32 = vpop.f32.mrf.mxu1 }
 0x175   :  { %v1711_v30 = vadd.f32 %v1710_v32, %v1682_v39 }
 0x177   :  { %v1722_v36 = vsel %vm109_vm0, %v1711_v30, 0 }
 0x178   :  { %v1748_v29 = vand.u32 4294901760, %v1722_v36 }
 0x17a   :  { %v1749_v14 = vsub.f32 %v1722_v36, %v1748_v29  ;;  %1814 = vmatmul.f32.vlgmr.msrb.gmra.mxu3 %v1748_v29 }
 0x17b   :  { %2086 = vmatpush.msrb.mxu3 %v1985_v52 }
 0x17c   :  { %1852 = vmatmul.f32.vlgmr.msra.gmra.mxu0 %v1749_v14  ;;  %v1750_v15 = vand.u32 4294901760, %v1749_v14 }
 0x17d   :  { %2088 = vmatpush.msrb.mxu3 %v1987_v10  ;;  %2115 = vmatpush.msra.mxu0 %v2016_v21 }
 0x17e   :  { %1883 = vmatmul.f32.vlgmr.msra.gmra.mxu1 %v1750_v15  ;;  %v1751_v9 = vsub.f32 %v1749_v14, %v1750_v15 }
 0x17f   :  { %2090 = vmatpush.msrb.mxu3 %v1989_v0  ;;  %2119 = vmatpush.msra.mxu0 %v2022_v3 }
 0x180   :  { %v1752_v27 = vand.u32 4294901760, %v1751_v9  ;;  %2146 = vmatpush.msra.mxu1 %v1985_v52 }
 0x181   :  { %2092 = vmatpush.msrb.mxu3 %v1991_v13  ;;  %2123 = vmatpush.msra.mxu0 %v2028_v37 }
 0x182   :  { %1753 = vmatmul.f32.vlgmr.msrb.gmra.mxu2 %v1752_v27  ;;  %1957 = vmatmul.f32.vlgmr.msra.gmra.mxu3 %v1748_v29 }
 0x183   :  { %2057 = vmatpush.msrb.mxu2 %v2015_v7  ;;  %2127 = vmatpush.msra.mxu0 %v2034_v8 }
 0x184   :  { %2148 = vmatpush.msra.mxu1 %v1987_v10 }
 0x185   :  { %2060 = vmatpush.msrb.mxu2 %v2021_v11 }
 0x186   :  { %2150 = vmatpush.msra.mxu1 %v1989_v0 }
 0x187   :  { %2063 = vmatpush.msrb.mxu2 %v2027_v50 }
 0x188   :  { %2152 = vmatpush.msra.mxu1 %v1991_v13 }
 0x189   :  { %2066 = vmatpush.msrb.mxu2 %v2033_v26 }
 0x18a   :  { %1928 = vmatmul.f32.vlgmr.msra.gmra.mxu2 %v1748_v29 }
 0x1f9   :  { %v1853_v31 = vpop.f32.mrf.mxu0 }
 0x1fb   :  { %v1884_v4 = vpop.f32.mrf.mxu1 }
 0x1fd   :  { %v1815_v25 = vpop.f32.mrf.mxu3 }
 0x205   :  { %v1754_v57 = vpop.f32.mrf.mxu2  ;;  %v1958_v41 = vpop.f32.mrf.mxu3 }
 0x206   :  { %v1816_v53 = vadd.f32 %v1815_v25, %v1754_v57 }
 0x208   :  { %v1854_v22 = vadd.f32 %v1853_v31, %v1816_v53 }
 0x20a   :  { %v1885_v28 = vadd.f32 %v1884_v4, %v1854_v22 }
 0x20d   :  { %v1929_v46 = vpop.f32.mrf.mxu2 }
 0x20e   :  { %v1930_v44 = vadd.f32 %v1929_v46, %v1885_v28 }
 0x210   :  { %v1959_v23 = vadd.f32 %v1958_v41, %v1930_v44 }
 0x212   :  { %v1971_v17 = vsel %vm1969_vm1, %v1959_v23, 0 }
 0x213   :  { %v1993_v19 = vand.u32 4294901760, %v1971_v17 }
 0x215   :  { %v1994_v16 = vsub.f32 %v1971_v17, %v1993_v19  ;;  %2039 = vmatmul.f32.vlgmr.msrb.gmra.mxu1 %v1993_v19 }
 0x217   :  { %2069 = vmatmul.f32.vlgmr.msrb.gmra.mxu2 %v1994_v16  ;;  %v1995_v51 = vand.u32 4294901760, %v1994_v16 }
 0x219   :  { %2096 = vmatmul.f32.vlgmr.msrb.gmra.mxu3 %v1995_v51  ;;  %v1996_v56 = vsub.f32 %v1994_v16, %v1995_v51 }
 0x21b   :  { %v1997_v45 = vand.u32 4294901760, %v1996_v56 }
 0x21d   :  { %1998 = vmatmul.f32.vlgmr.msrb.gmra.mxu0 %v1997_v45  ;;  %2154 = vmatmul.f32.vlgmr.msra.gmra.mxu1 %v1993_v19 }
 0x225   :  { %2129 = vmatmul.f32.vlgmr.msra.gmra.mxu0 %v1993_v19 }
 0x292   :  { %v2040_v2 = vpop.f32.mrf.mxu1 }
 0x29a   :  { %v1999_v49 = vpop.f32.mrf.mxu0  ;;  %v2070_v61 = vpop.f32.mrf.mxu2 }
 0x29b   :  { %v2000_v20 = vadd.f32 %v2176_v43, %v1999_v49  ;;  %v2155_v48 = vpop.f32.mrf.mxu1 }
 0x29c   :  { %v2097_v18 = vpop.f32.mrf.mxu3 }
 0x29d   :  { %v2041_v62 = vadd.f32 %v2040_v2, %v2000_v20 }
 0x29f   :  { %v2071_v38 = vadd.f32 %v2070_v61, %v2041_v62 }
 0x2a1   :  { %v2098_v5 = vadd.f32 %v2097_v18, %v2071_v38 }
 0x2a2   :  { %v2130_v33 = vpop.f32.mrf.mxu0 }
 0x2a3   :  { %v2131_v34 = vadd.f32 %v2130_v33, %v2098_v5 }
 0x2a5   :  { %v2156_v63 = vadd.f32 %v2155_v48, %v2131_v34 }
 0x2a7   :  { %2158 = vst [vmem:[#allocation2] sm:$0x3] %v2156_v63 }
 0x2a8   :  { %2169 = dma.vmem_to_hbm [thread:$0]  %s2165_s13, 32, %s2167_s15, [#allocation3]  }
 0x2a9   :  { %2201 = dma.done.wait [#allocation3], 32  }
 0x2aa   :  { %2202 = vsyncadd [#allocation3], 4294967264 }
 0x2ab   :  { %2174 = vsyncpa [#allocation3], 1 }

</bundles_post_ra>
